<compile_context>
chip_gen: v7x
topology: tpu7x:2x2x1
jax: 0.10.0
libtpu: 0.0.40
codegen_flags: <defaults>
</compile_context>

<pallas_src>
import functools

import jax
import jax.numpy as jnp
from jax import lax
from jax.experimental import pallas as pl
from jax.experimental.pallas import tpu as pltpu

EPS = 1e-5
_FULLPACK_K_CAP = 768          # max K for the single-matmul (im2col-in-VMEM) path


def _round_up(a, b):
    return ((a + b - 1) // b) * b


# -----------------------------------------------------------------------------
# per-chip configuration
# -----------------------------------------------------------------------------
def _chip_kind():
    try:
        kind = jax.devices()[0].device_kind.lower()
    except Exception:
        return "other"
    if "v5 lite" in kind or "v5e" in kind or "v5litepod" in kind:
        return "v5e"
    if "v6" in kind:
        return "v6e"
    if "v7" in kind:
        return "v7x"
    return "other"


_CHIP = _chip_kind()
_CFG = {
    #        MXU K      per-step VMEM budget    scoped VMEM limit
    "v5e":   dict(mxu_k=128, step_budget=32 << 20, vmem_limit=64 << 20),
    "v6e":   dict(mxu_k=256, step_budget=40 << 20, vmem_limit=96 << 20),
    "v7x":   dict(mxu_k=256, step_budget=24 << 20, vmem_limit=48 << 20),
    "other": dict(mxu_k=256, step_budget=24 << 20, vmem_limit=48 << 20),
}[_CHIP]


def _select_tco(cout, kh, kw, cin):
    """Cout tile: 256 fills the v6e/v7x 2x256 MXU N dim, 128 matches v5e."""
    if cout < 256 or cout % 128 != 0:
        return cout
    if _CHIP == "v5e":
        return 128
    if cout % 256 == 0:
        # v7x has only 64 MiB VMEM/TC: keep the double-buffered weight block small.
        if _CHIP == "v7x" and 2 * kh * kw * cin * 256 * 2 > 16 * 1024 * 1024:
            return 128
        return 256
    return 128


# -----------------------------------------------------------------------------
# Pallas kernel: fused direct conv (K-packed MXU matmuls) + folded-BN bias
#                [+ residual] [+ ReLU]
# -----------------------------------------------------------------------------
@functools.lru_cache(maxsize=None)
def _make_kernel(kh, kw, relu, has_residual, pack):
    """Block shapes seen by the kernel:
      x_ref : (TN, Hp, Wp, Cin)            bf16 padded input tile
      w_ref : pack == 'full'  -> (kw*kh*Cin, TCo)
              pack == 'hpack' -> (kw, kh*Cin, TCo)
              pack == 'taps'  -> (kh, kw, Cin, TCo)   (bf16, BN scale folded in)
      b_ref : (1, TCo)                      f32 folded-BN bias
      r_ref : (TN, Ho, Wo, TCo)             bf16 residual (optional)
      o_ref : (TN, Ho, Wo, TCo)             bf16 output
    """
    def kernel(*refs):
        if has_residual:
            x_ref, w_ref, b_ref, r_ref, o_ref = refs
        else:
            x_ref, w_ref, b_ref, o_ref = refs
        tn, ho, wo, tco = o_ref.shape
        cin = x_ref.shape[-1]
        m = tn * ho * wo

        # accumulator initialized with the broadcast bias (saves a VPU pass)
        bias = jnp.broadcast_to(b_ref[...], (m, tco)).astype(jnp.float32)

        if pack == "full":
            # in-VMEM im2col: ONE MXU matmul with K = kh*kw*cin.
            cols = []
            for j in range(kw):                        # kw misaligned W shifts only
                xj = x_ref[:, :, j:j + wo, :]
                for i in range(kh):                    # cheap major-dim H slices
                    cols.append(xj[:, i:i + ho].reshape(m, cin))
            op = jnp.concatenate(cols, axis=-1) if len(cols) > 1 else cols[0]
            acc = bias + jnp.dot(op, w_ref[...],
                                 preferred_element_type=jnp.float32)
        elif pack == "hpack":
            # pack the kh H-taps into K: kw matmuls with K = kh*cin.
            acc = bias
            for j in range(kw):
                xj = x_ref[:, :, j:j + wo, :]
                pieces = [xj[:, i:i + ho].reshape(m, cin) for i in range(kh)]
                op = jnp.concatenate(pieces, axis=-1) if kh > 1 else pieces[0]
                acc = acc + jnp.dot(op, w_ref[j],
                                    preferred_element_type=jnp.float32)
        else:  # "taps": cin already fills the MXU K dim
            acc = bias
            for j in range(kw):
                xj = x_ref[:, :, j:j + wo, :]          # W shift hoisted out of i loop
                for i in range(kh):
                    acc = acc + jnp.dot(xj[:, i:i + ho].reshape(m, cin),
                                        w_ref[i, j],
                                        preferred_element_type=jnp.float32)

        acc = acc.reshape(tn, ho, wo, tco)
        if has_residual:
            acc = acc + r_ref[...].astype(jnp.float32)   # pre-activation add
        if relu:
            acc = jnp.maximum(acc, 0.0)
        o_ref[...] = acc.astype(o_ref.dtype)

    return kernel


# -----------------------------------------------------------------------------
# stride-2 -> stride-1 rewrite (exact): space-to-depth + weight repack
# -----------------------------------------------------------------------------
def _space_to_depth2(x):
    """(N, H, W, C) -> (N, H//2, W//2, 4*C); channel order ((p*2+q)*C + c)."""
    n, h, w, c = x.shape
    x = x.reshape(n, h // 2, 2, w // 2, 2, c)
    x = jnp.transpose(x, (0, 1, 3, 2, 4, 5))
    return x.reshape(n, h // 2, w // 2, 4 * c)


def _weights_for_stride2(w):
    """(k,k,Cin,Cout) stride-2 weights -> (ceil(k/2),ceil(k/2),4*Cin,Cout)
    stride-1 weights over the space-to-depth input (out-of-range taps = 0)."""
    k, _, cin, cout = w.shape
    k2 = (k + 1) // 2
    w2 = jnp.zeros((k2, k2, 2, 2, cin, cout), w.dtype)
    for p in range(2):
        for q in range(2):
            sub = w[p::2, q::2]
            w2 = w2.at[:sub.shape[0], :sub.shape[1], p, q].set(sub)
    return w2.reshape(k2, k2, 4 * cin, cout)


# -----------------------------------------------------------------------------
# wrapper: one fused pallas_call per conv+BN(+residual)(+ReLU)
# -----------------------------------------------------------------------------
def conv_bn_pallas(x, w, scale, bias, *, kernel_size, stride, relu, residual=None):
    """x: (N,H,W,Cin) NHWC activations.  w: (k,k,Cin,Cout) HWIO f32 weights.
    scale/bias: (Cout,) folded BN params.  residual: optional (N,Ho,Wo,Cout).
    Returns (N, Ho, Wo, Cout) bf16."""
    k = kernel_size
    pad = k // 2                               # Conv2dAuto 'same' padding
    n, h, wdt, _ = x.shape
    cout = w.shape[-1]
    ho = (h + 2 * pad - k) // stride + 1
    wo = (wdt + 2 * pad - k) // stride + 1
    wo_pad = _round_up(wo, 8)                  # tile-aligned in-kernel reshapes
    extra = wo_pad - wo

    # fold BN scale into the weights; bf16 operands for the MXU
    w = (w * scale.reshape(1, 1, 1, -1)).astype(jnp.bfloat16)
    b = bias.astype(jnp.float32).reshape(1, cout)
    x = x.astype(jnp.bfloat16)

    # ---- input prep: ONE jnp.pad per layer ('same' + parity + lane-align pad
    # merged), then (for stride 2) space-to-depth -------------------------------
    if stride == 1:
        kh = kw = k
        xp = jnp.pad(x, ((0, 0), (pad, pad), (pad, wo_pad - wdt + pad), (0, 0)))
    elif k == 1:
        kh = kw = 1
        xp = x[:, ::stride, ::stride, :]       # strided 1x1 conv == subsample
        if extra:
            xp = jnp.pad(xp, ((0, 0), (0, 0), (0, extra), (0, 0)))
    else:
        assert stride == 2, "module only uses stride 1 or 2"
        kh = kw = (k + 1) // 2
        hp2 = ho + kh - 1
        wp2 = wo_pad + kw - 1
        xp = jnp.pad(x, ((0, 0), (pad, 2 * hp2 - h - pad),
                         (pad, 2 * wp2 - wdt - pad), (0, 0)))
        xp = _space_to_depth2(xp)              # stride-2 conv -> stride-1 conv
        w = _weights_for_stride2(w)

    _, hp, wp, cin = xp.shape
    assert hp - kh + 1 == ho and wp - kw + 1 == wo_pad

    has_res = residual is not None

    # ---- per-chip tiling & packing mode ---------------------------------------
    mxu_k = _CFG["mxu_k"]
    tco = _select_tco(cout, kh, kw, cin)
    n_co = cout // tco

    kfull = cin * kh * kw
    if kfull <= _FULLPACK_K_CAP and cin < 256:
        pack = "full"
    elif cin < mxu_k:
        pack = "hpack"
    else:
        pack = "taps"

    def step_bytes(tn, pk):
        kp = {"full": kh * kw * cin, "hpack": kh * cin, "taps": cin}[pk]
        m = tn * ho * wo_pad
        bb = 2 * tn * hp * wp * cin * 2          # bf16 input block, double-buffered
        bb += 2 * kh * kw * cin * tco * 2        # bf16 weight block, double-buffered
        bb += 2 * tn * ho * wo_pad * tco * 2     # bf16 output block
        if has_res:
            bb += 2 * tn * ho * wo_pad * tco * 2
        bb += m * tco * 4                        # f32 accumulator
        bb += tn * hp * wo_pad * cin * 2         # per-j shifted slice
        bb += m * kp * 2                         # packed operand / per-tap slice
        return bb

    # demote the packing mode if even a tn=1 step would blow the VMEM budget
    while pack != "taps" and step_bytes(1, pack) > _CFG["step_budget"]:
        pack = "hpack" if pack == "full" else "taps"

    tn = 1
    for cand in range(n, 0, -1):
        if n % cand == 0 and step_bytes(cand, pack) <= _CFG["step_budget"]:
            tn = cand
            break

    # v7x has two TensorCores driven by parallel grid axes: avoid a (1,1) grid
    if _CHIP == "v7x" and (n // tn) * n_co == 1 and n >= 2 and n % 2 == 0:
        tn = n // 2
    # TODO(synk): n==1 and n_co==1 still idles one v7x TensorCore; splitting the
    # output-H axis needs overlapping input blocks (pl.Element index maps).

    n_bt = n // tn

    # ---- grid ordering: keep the heavier operand resident on the fast axis ----
    w_refetch = kh * kw * cin * cout * 2 * (n_bt - 1)   # weights re-fetched if bt slow
    x_refetch = n * hp * wp * cin * 2 * (n_co - 1)      # input re-fetched if co slow
    cout_major = n_bt > 1 and n_co > 1 and w_refetch > x_refetch

    if cout_major:
        grid = (n_co, n_bt)
        def _split(g0, g1): return g0, g1               # -> (co, bt)
    else:
        grid = (n_bt, n_co)
        def _split(g0, g1): return g1, g0               # -> (co, bt)

    def x_map(g0, g1):
        co, bt = _split(g0, g1); return (bt, 0, 0, 0)

    def o_map(g0, g1):
        co, bt = _split(g0, g1); return (bt, 0, 0, co)

    def b_map(g0, g1):
        co, bt = _split(g0, g1); return (0, co)

    # weights laid out in the wrapper so the kernel does zero layout work
    if pack == "full":
        w_in = jnp.transpose(w, (1, 0, 2, 3)).reshape(kw * kh * cin, cout)

        def w_map(g0, g1):
            co, bt = _split(g0, g1); return (0, co)
        w_spec = pl.BlockSpec((kw * kh * cin, tco), w_map)
    elif pack == "hpack":
        w_in = jnp.transpose(w, (1, 0, 2, 3)).reshape(kw, kh * cin, cout)

        def w_map(g0, g1):
            co, bt = _split(g0, g1); return (0, 0, co)
        w_spec = pl.BlockSpec((kw, kh * cin, tco), w_map)
    else:
        w_in = w

        def w_map(g0, g1):
            co, bt = _split(g0, g1); return (0, 0, 0, co)
        w_spec = pl.BlockSpec((kh, kw, cin, tco), w_map)

    inputs = [xp, w_in, b]
    in_specs = [pl.BlockSpec((tn, hp, wp, cin), x_map),
                w_spec,
                pl.BlockSpec((1, tco), b_map)]
    if has_res:
        r = residual.astype(jnp.bfloat16)
        if extra:
            r = jnp.pad(r, ((0, 0), (0, 0), (0, extra), (0, 0)))
        inputs.append(r)
        in_specs.append(pl.BlockSpec((tn, ho, wo_pad, tco), o_map))

    out = pl.pallas_call(
        _make_kernel(kh, kw, bool(relu), has_res, pack),
        out_shape=jax.ShapeDtypeStruct((n, ho, wo_pad, cout), jnp.bfloat16),
        grid=grid,
        in_specs=in_specs,
        out_specs=pl.BlockSpec((tn, ho, wo_pad, tco), o_map),
        compiler_params=pltpu.CompilerParams(
            dimension_semantics=("parallel", "parallel"),
            vmem_limit_bytes=_CFG["vmem_limit"],
        ),
    )(*inputs)
    if extra:
        # TODO(synk): carrying the padded width (zero-masked) into the next
        # layer's pad would remove this slice; XLA fuses it with the next pad.
        out = out[:, :, :wo, :]
    return out


# -----------------------------------------------------------------------------
# precision-matched pure-JAX reference (bf16 operands, f32 accumulation)
# -----------------------------------------------------------------------------
def conv_bn_ref(x, w, scale, bias, *, kernel_size, stride, relu, residual=None):
    p = kernel_size // 2
    w = (w * scale.reshape(1, 1, 1, -1)).astype(jnp.bfloat16)
    x = x.astype(jnp.bfloat16)
    out = lax.conv_general_dilated(
        x, w, window_strides=(stride, stride), padding=((p, p), (p, p)),
        dimension_numbers=("NHWC", "HWIO", "NHWC"),
        preferred_element_type=jnp.float32)
    out = out + bias.reshape(1, 1, 1, -1).astype(jnp.float32)
    if residual is not None:
        out = out + residual.astype(jnp.float32)
    if relu:
        out = jnp.maximum(out, 0.0)
    return out.astype(jnp.bfloat16)


# -----------------------------------------------------------------------------
# deterministic parameter initialization (mirrors module __init__ shapes)
# -----------------------------------------------------------------------------
def _conv_w(key, k, cin, cout):
    std = 1.0 / jnp.sqrt(float(k * k * cin))
    return jax.random.normal(key, (k, k, cin, cout), jnp.float32) * std


def _bn_params(key, c):
    k1, k2, k3, k4 = jax.random.split(key, 4)
    gamma = 1.0 + 0.1 * jax.random.normal(k1, (c,), jnp.float32)
    beta = 0.1 * jax.random.normal(k2, (c,), jnp.float32)
    mean = 0.1 * jax.random.normal(k3, (c,), jnp.float32)
    var = 1.0 + 0.1 * jax.random.uniform(k4, (c,), jnp.float32)
    scale = gamma / jnp.sqrt(var + EPS)
    bias = beta - mean * scale
    return scale, bias


def init_params(key, in_channels, blocks_sizes, deepths):
    params = {}
    key, kg1, kg2 = jax.random.split(key, 3)
    params["gate"] = {"w": _conv_w(kg1, 7, in_channels, blocks_sizes[0]),
                      "bn": _bn_params(kg2, blocks_sizes[0])}
    in_out = [(blocks_sizes[0], blocks_sizes[0])] + list(zip(blocks_sizes, blocks_sizes[1:]))
    for k in (3, 5, 7):
        branch = []
        for (cin, cout), nblk in zip(in_out, deepths):
            layer = []
            for bidx in range(nblk):
                bin_c = cin if bidx == 0 else cout
                ds = (2 if cin != cout else 1) if bidx == 0 else 1
                key, k1, k2, k3, k4, k5, k6 = jax.random.split(key, 7)
                blk = {"w1": _conv_w(k1, k, bin_c, cout), "bn1": _bn_params(k2, cout),
                       "w2": _conv_w(k3, k, cout, cout), "bn2": _bn_params(k4, cout),
                       "stride": ds}
                if bin_c != cout:  # shortcut: 1x1 conv stride=ds + BN
                    blk["ws"] = _conv_w(k5, 1, bin_c, cout)
                    blk["bns"] = _bn_params(k6, cout)
                layer.append(blk)
            branch.append(layer)
        params[f"branch_{k}"] = branch
    return params


# -----------------------------------------------------------------------------
# forward pass (ResNetEncoder.forward)
# -----------------------------------------------------------------------------
def basic_block(x, blk, k, conv_fn):
    ds = blk["stride"]
    h = conv_fn(x, blk["w1"], *blk["bn1"], kernel_size=k, stride=ds, relu=True)
    if "ws" in blk:
        res = conv_fn(x, blk["ws"], *blk["bns"], kernel_size=1, stride=ds, relu=False)
    else:
        res = x
    # second conv_bn + residual + block-level ReLU, all fused in the kernel
    return conv_fn(h, blk["w2"], *blk["bn2"], kernel_size=k, stride=1,
                   relu=True, residual=res)


def forward(params, x_nchw, conv_fn):
    x = jnp.transpose(x_nchw, (0, 2, 3, 1))  # NCHW -> NHWC
    g = params["gate"]
    x0 = conv_fn(x, g["w"], *g["bn"], kernel_size=7, stride=2, relu=True)  # Gate
    branch_outs = []
    for k in (3, 5, 7):
        h = x0
        for layer in params[f"branch_{k}"]:
            for blk in layer:
                h = basic_block(h, blk, k, conv_fn)
        branch_outs.append(h)
    out = jnp.concatenate(branch_outs, axis=-1)   # torch.cat(..., dim=1) in NCHW
    out = jnp.transpose(out, (0, 3, 1, 2))        # back to NCHW
    return jnp.squeeze(out)                       # torch .squeeze()


# -----------------------------------------------------------------------------
# per-layer unit check (exercises each packing path / grid ordering)
# -----------------------------------------------------------------------------
def _check_layer(key, *, k, stride, cin, cout, res, h=16, w=16, n=2, tol=2e-2):
    k1, k2, k3, k4 = jax.random.split(key, 4)
    x = jax.random.normal(k1, (n, h, w, cin), jnp.float32)
    wgt = _conv_w(k2, k, cin, cout)
    scale, bias = _bn_params(k3, cout)
    pad = k // 2
    ho = (h + 2 * pad - k) // stride + 1
    wo = (w + 2 * pad - k) // stride + 1
    r = (0.5 * jax.random.normal(k4, (n, ho, wo, cout), jnp.float32)
         ).astype(jnp.bfloat16) if res else None
    out = conv_bn_pallas(x, wgt, scale, bias, kernel_size=k, stride=stride,
                         relu=True, residual=r)
    ref = conv_bn_ref(x, wgt, scale, bias, kernel_size=k, stride=stride,
                      relu=True, residual=r)
    o = jax.block_until_ready(out).astype(jnp.float32)
    rf = ref.astype(jnp.float32)
    assert o.shape == (n, ho, wo, cout), o.shape
    err = float(jnp.max(jnp.abs(o - rf)))
    scl = float(jnp.max(jnp.abs(rf))) + 1e-6
    assert err / scl < tol, (k, stride, cin, cout, err / scl)


if __name__ == "__main__":
    key = jax.random.PRNGKey(0)
    kp, kx, kt = jax.random.split(key, 3)

    # per-layer checks against the precision-matched reference
    tkeys = jax.random.split(kt, 6)
    _check_layer(tkeys[0], k=7, stride=2, cin=1, cout=8, res=False)      # gate (full pack)
    _check_layer(tkeys[1], k=3, stride=1, cin=8, cout=8, res=True)       # full pack + residual
    _check_layer(tkeys[2], k=5, stride=1, cin=16, cout=16, res=False)    # full pack
    _check_layer(tkeys[3], k=7, stride=1, cin=32, cout=32, res=True)     # hpack + residual
    _check_layer(tkeys[4], k=1, stride=2, cin=32, cout=64, res=False)    # strided 1x1 shortcut
    _check_layer(tkeys[5], k=3, stride=1, cin=128, cout=256, res=False)  # Cout tiling

    # full ResNetEncoder forward
    in_channels = 1
    blocks_sizes = [8, 16, 32, 64]   # small stand-in for [64, 128, 256, 512]
    deepths = [2, 2, 2, 2]

    params = init_params(kp, in_channels, blocks_sizes, deepths)
    x = jax.random.normal(kx, (2, in_channels, 32, 32), jnp.float32)

    out = jax.block_until_ready(forward(params, x, conv_fn=conv_bn_pallas))
    ref = jax.block_until_ready(forward(params, x, conv_fn=conv_bn_ref))

    assert out.shape == (2, 3 * blocks_sizes[-1], 2, 2), out.shape
    o = out.astype(jnp.float32)
    r = ref.astype(jnp.float32)
    err = float(jnp.max(jnp.abs(o - r)))
    scale_ = float(jnp.max(jnp.abs(r))) + 1e-6
    # bf16 activations through a deep conv stack -> compare relative to scale
    assert err / scale_ < 6e-2, f"rel err {err / scale_:.4f} (abs {err}, scale {scale_})"
    print("KERNEL_OK")
</pallas_src>

<mosaic_0001>
module attributes {stable_mosaic.version = 11 : i64} {
  func.func @kernel(%arg0: i32, %arg1: i32, %arg2: memref<2x11x11x4xbf16, #tpu.memory_space<vmem>>, %arg3: memref<64x8xbf16, #tpu.memory_space<vmem>>, %arg4: memref<1x8xf32, #tpu.memory_space<vmem>>, %arg5: memref<2x8x8x8xbf16, #tpu.memory_space<vmem>>) attributes {dimension_semantics = [#tpu.dimension_semantics<parallel>, #tpu.dimension_semantics<parallel>], iteration_bounds = array<i64: 1, 1>, scalar_prefetch = 0 : i64, scratch_operands = 0 : i64, tpu.core_type = #tpu.core_type<tc>, window_params = [{transform_indices = @transform_0, window_bounds = array<i64: 2, 11, 11, 4>}, {transform_indices = @transform_1, window_bounds = array<i64: 64, 8>}, {transform_indices = @transform_2, window_bounds = array<i64: 1, 8>}, {transform_indices = @transform_3, window_bounds = array<i64: 2, 8, 8, 8>}]} {
    %c0 = arith.constant 0 : index
    %c0_0 = arith.constant 0 : index
    %0 = vector.load %arg4[%c0, %c0_0] : memref<1x8xf32, #tpu.memory_space<vmem>>, vector<1x8xf32>
    %1 = vector.shape_cast %0 : vector<1x8xf32> to vector<1x8xf32>
    %2 = vector.broadcast %1 : vector<1x8xf32> to vector<128x8xf32>
    %c0_1 = arith.constant 0 : index
    %c0_2 = arith.constant 0 : index
    %c0_3 = arith.constant 0 : index
    %c0_4 = arith.constant 0 : index
    %3 = vector.load %arg2[%c0_1, %c0_2, %c0_3, %c0_4] : memref<2x11x11x4xbf16, #tpu.memory_space<vmem>>, vector<2x11x8x4xbf16>
    %4 = vector.extract_strided_slice %3 {offsets = [0, 0, 0, 0], sizes = [2, 8, 8, 4], strides = [1, 1, 1, 1]} : vector<2x11x8x4xbf16> to vector<2x8x8x4xbf16>
    %5 = vector.shape_cast %4 : vector<2x8x8x4xbf16> to vector<128x4xbf16>
    %6 = vector.extract_strided_slice %3 {offsets = [0, 1, 0, 0], sizes = [2, 8, 8, 4], strides = [1, 1, 1, 1]} : vector<2x11x8x4xbf16> to vector<2x8x8x4xbf16>
    %7 = vector.shape_cast %6 : vector<2x8x8x4xbf16> to vector<128x4xbf16>
    %8 = vector.extract_strided_slice %3 {offsets = [0, 2, 0, 0], sizes = [2, 8, 8, 4], strides = [1, 1, 1, 1]} : vector<2x11x8x4xbf16> to vector<2x8x8x4xbf16>
    %9 = vector.shape_cast %8 : vector<2x8x8x4xbf16> to vector<128x4xbf16>
    %10 = vector.extract_strided_slice %3 {offsets = [0, 3, 0, 0], sizes = [2, 8, 8, 4], strides = [1, 1, 1, 1]} : vector<2x11x8x4xbf16> to vector<2x8x8x4xbf16>
    %11 = vector.shape_cast %10 : vector<2x8x8x4xbf16> to vector<128x4xbf16>
    %c0_5 = arith.constant 0 : index
    %c0_6 = arith.constant 0 : index
    %c1 = arith.constant 1 : index
    %c0_7 = arith.constant 0 : index
    %12 = vector.load %arg2[%c0_5, %c0_6, %c1, %c0_7] : memref<2x11x11x4xbf16, #tpu.memory_space<vmem>>, vector<2x11x8x4xbf16>
    %13 = vector.extract_strided_slice %12 {offsets = [0, 0, 0, 0], sizes = [2, 8, 8, 4], strides = [1, 1, 1, 1]} : vector<2x11x8x4xbf16> to vector<2x8x8x4xbf16>
    %14 = vector.shape_cast %13 : vector<2x8x8x4xbf16> to vector<128x4xbf16>
    %15 = vector.extract_strided_slice %12 {offsets = [0, 1, 0, 0], sizes = [2, 8, 8, 4], strides = [1, 1, 1, 1]} : vector<2x11x8x4xbf16> to vector<2x8x8x4xbf16>
    %16 = vector.shape_cast %15 : vector<2x8x8x4xbf16> to vector<128x4xbf16>
    %17 = vector.extract_strided_slice %12 {offsets = [0, 2, 0, 0], sizes = [2, 8, 8, 4], strides = [1, 1, 1, 1]} : vector<2x11x8x4xbf16> to vector<2x8x8x4xbf16>
    %18 = vector.shape_cast %17 : vector<2x8x8x4xbf16> to vector<128x4xbf16>
    %19 = vector.extract_strided_slice %12 {offsets = [0, 3, 0, 0], sizes = [2, 8, 8, 4], strides = [1, 1, 1, 1]} : vector<2x11x8x4xbf16> to vector<2x8x8x4xbf16>
    %20 = vector.shape_cast %19 : vector<2x8x8x4xbf16> to vector<128x4xbf16>
    %c0_8 = arith.constant 0 : index
    %c0_9 = arith.constant 0 : index
    %c2 = arith.constant 2 : index
    %c0_10 = arith.constant 0 : index
    %21 = vector.load %arg2[%c0_8, %c0_9, %c2, %c0_10] : memref<2x11x11x4xbf16, #tpu.memory_space<vmem>>, vector<2x11x8x4xbf16>
    %22 = vector.extract_strided_slice %21 {offsets = [0, 0, 0, 0], sizes = [2, 8, 8, 4], strides = [1, 1, 1, 1]} : vector<2x11x8x4xbf16> to vector<2x8x8x4xbf16>
    %23 = vector.shape_cast %22 : vector<2x8x8x4xbf16> to vector<128x4xbf16>
    %24 = vector.extract_strided_slice %21 {offsets = [0, 1, 0, 0], sizes = [2, 8, 8, 4], strides = [1, 1, 1, 1]} : vector<2x11x8x4xbf16> to vector<2x8x8x4xbf16>
    %25 = vector.shape_cast %24 : vector<2x8x8x4xbf16> to vector<128x4xbf16>
    %26 = vector.extract_strided_slice %21 {offsets = [0, 2, 0, 0], sizes = [2, 8, 8, 4], strides = [1, 1, 1, 1]} : vector<2x11x8x4xbf16> to vector<2x8x8x4xbf16>
    %27 = vector.shape_cast %26 : vector<2x8x8x4xbf16> to vector<128x4xbf16>
    %28 = vector.extract_strided_slice %21 {offsets = [0, 3, 0, 0], sizes = [2, 8, 8, 4], strides = [1, 1, 1, 1]} : vector<2x11x8x4xbf16> to vector<2x8x8x4xbf16>
    %29 = vector.shape_cast %28 : vector<2x8x8x4xbf16> to vector<128x4xbf16>
    %c0_11 = arith.constant 0 : index
    %c0_12 = arith.constant 0 : index
    %c3 = arith.constant 3 : index
    %c0_13 = arith.constant 0 : index
    %30 = vector.load %arg2[%c0_11, %c0_12, %c3, %c0_13] : memref<2x11x11x4xbf16, #tpu.memory_space<vmem>>, vector<2x11x8x4xbf16>
    %31 = vector.extract_strided_slice %30 {offsets = [0, 0, 0, 0], sizes = [2, 8, 8, 4], strides = [1, 1, 1, 1]} : vector<2x11x8x4xbf16> to vector<2x8x8x4xbf16>
    %32 = vector.shape_cast %31 : vector<2x8x8x4xbf16> to vector<128x4xbf16>
    %33 = vector.extract_strided_slice %30 {offsets = [0, 1, 0, 0], sizes = [2, 8, 8, 4], strides = [1, 1, 1, 1]} : vector<2x11x8x4xbf16> to vector<2x8x8x4xbf16>
    %34 = vector.shape_cast %33 : vector<2x8x8x4xbf16> to vector<128x4xbf16>
    %35 = vector.extract_strided_slice %30 {offsets = [0, 2, 0, 0], sizes = [2, 8, 8, 4], strides = [1, 1, 1, 1]} : vector<2x11x8x4xbf16> to vector<2x8x8x4xbf16>
    %36 = vector.shape_cast %35 : vector<2x8x8x4xbf16> to vector<128x4xbf16>
    %37 = vector.extract_strided_slice %30 {offsets = [0, 3, 0, 0], sizes = [2, 8, 8, 4], strides = [1, 1, 1, 1]} : vector<2x11x8x4xbf16> to vector<2x8x8x4xbf16>
    %38 = vector.shape_cast %37 : vector<2x8x8x4xbf16> to vector<128x4xbf16>
    %39 = tpu.concatenate %5, %7, %9, %11, %14, %16, %18, %20, %23, %25, %27, %29, %32, %34, %36, %38 in 1 : vector<128x4xbf16>, vector<128x4xbf16>, vector<128x4xbf16>, vector<128x4xbf16>, vector<128x4xbf16>, vector<128x4xbf16>, vector<128x4xbf16>, vector<128x4xbf16>, vector<128x4xbf16>, vector<128x4xbf16>, vector<128x4xbf16>, vector<128x4xbf16>, vector<128x4xbf16>, vector<128x4xbf16>, vector<128x4xbf16>, vector<128x4xbf16> -> vector<128x64xbf16>
    %c0_14 = arith.constant 0 : index
    %c0_15 = arith.constant 0 : index
    %40 = vector.load %arg3[%c0_14, %c0_15] : memref<64x8xbf16, #tpu.memory_space<vmem>>, vector<64x8xbf16>
    %cst = arith.constant dense<0.000000e+00> : vector<128x8xf32>
    %41 = tpu.matmul %39, %40, %cst {dimension_numbers = #tpu.dot_dimension_numbers<[1], [0], [0], [1], [0, 0, 1, 1], [], []>} : vector<128x64xbf16>, vector<64x8xbf16>, vector<128x8xf32> -> vector<128x8xf32>
    %42 = arith.addf %2, %41 : vector<128x8xf32>
    %43 = vector.shape_cast %42 : vector<128x8xf32> to vector<2x8x8x8xf32>
    %cst_16 = arith.constant 0.000000e+00 : f32
    %44 = vector.broadcast %cst_16 : f32 to vector<2x8x8x8xf32>
    %45 = arith.maximumf %43, %44 : vector<2x8x8x8xf32>
    %46 = arith.truncf %45 : vector<2x8x8x8xf32> to vector<2x8x8x8xbf16>
    %c0_17 = arith.constant 0 : index
    %c0_18 = arith.constant 0 : index
    %c0_19 = arith.constant 0 : index
    %c0_20 = arith.constant 0 : index
    %47 = vector.load %arg5[%c0_17, %c0_18, %c0_19, %c0_20] : memref<2x8x8x8xbf16, #tpu.memory_space<vmem>>, vector<2x8x8x8xbf16>
    tpu.vector_store %arg5[%c0_17, %c0_18, %c0_19, %c0_20], %46 {strides = array<i32>} : memref<2x8x8x8xbf16, #tpu.memory_space<vmem>>, vector<2x8x8x8xbf16>,
    return
  }
  func.func @transform_0(%arg0: i32, %arg1: i32) -> (i32, i32, i32, i32) {
    %c0_i32 = arith.constant 0 : i32
    %c0_i32_0 = arith.constant 0 : i32
    %c0_i32_1 = arith.constant 0 : i32
    %c0_i32_2 = arith.constant 0 : i32
    return %arg0, %c0_i32, %c0_i32_0, %c0_i32_1 : i32, i32, i32, i32
  }
  func.func @transform_1(%arg0: i32, %arg1: i32) -> (i32, i32) {
    %c0_i32 = arith.constant 0 : i32
    %c0_i32_0 = arith.constant 0 : i32
    return %c0_i32, %arg1 : i32, i32
  }
  func.func @transform_2(%arg0: i32, %arg1: i32) -> (i32, i32) {
    %c0_i32 = arith.constant 0 : i32
    %c0_i32_0 = arith.constant 0 : i32
    return %c0_i32, %arg1 : i32, i32
  }
  func.func @transform_3(%arg0: i32, %arg1: i32) -> (i32, i32, i32, i32) {
    %c0_i32 = arith.constant 0 : i32
    %c0_i32_0 = arith.constant 0 : i32
    %c0_i32_1 = arith.constant 0 : i32
    return %arg0, %c0_i32, %c0_i32_0, %arg1 : i32, i32, i32, i32
  }
}

</mosaic_0001>

<bundles_post_ra>
// kernel: tpu_custom_call.1
= control target key start
LH: loop header
LB: loop body
LE: loop exit
PB: predicated region body
PF: predicated region fallthrough
CT: control target
= control target key end

     0   :  { %s2100_s20 = smov 4   ;;  %vm67_vm0 = vsmask.f32 3328  ;;  %s2101_s14 = smov 8   ;;  %vm68_vm1 = vsmask.f32 7440  ;;  %s3646_s0 = inlined_call_operand.vmem [shape: bf16[2,11,11,4], index: 0, kind: input, shape index: {}]   ;;  %s3647_s1 = inlined_call_operand.vmem [shape: bf16[64,8], index: 1, kind: input, shape index: {}]   ;;  %s3648_s2 = inlined_call_operand.vmem [shape: f32[1,8], index: 2, kind: input, shape index: {}]   ;;  %s3649_s3 = inlined_call_operand.hbm [shape: bf16[2,8,8,8], index: 3, kind: output, shape index: {}]  }
   0x1   :  { %v26_v0 = vld [vmem:[%s3646_s0 + $0x18] sm:$0xf]  ;;  %v27_v1 = vld [vmem:[%s3646_s0 + $0x20] sm:$0xf]  ;;  %v2148_v6 = vld [vmem:[%s3646_s0 + $0x8] sm:$0xf] }
   0x2   :  { %v127_v2 = vshrl.u32 %v27_v1, 16  ;;  %v130_v3 = vshll.u32 %v27_v1, 16  ;;  %v2143_v4 = vcombine.low %v26_v0, %v27_v1  ;;  %v113_v5 = vshrl.u32 %v26_v0, 16  ;;  %3668 = vst [vmem:[#allocation5_spill] sm:$0xff] %v2148_v6  ;;  %v25_v8 = vld [vmem:[%s3646_s0 + $0x10] sm:$0xf]  ;;  %vm2302_vm2 = vmor %vm67_vm0, %vm68_vm1 }
   0x3   :  { %v116_v7 = vshll.u32 %v26_v0, 16  ;;  %v85_v9 = vshrl.u32 %v2148_v6, 16  ;;  %v88_v10 = vshll.u32 %v2148_v6, 16  ;;  %v99_v11 = vshrl.u32 %v25_v8, 16  ;;  %v2160_v12 = vld [vmem:[%s3646_s0 + $0x70] sm:$0xf] }
   0x4   :  { %1010 = vrot.lane.b32.xlu1 %v2143_v4, %s2100_s20  ;;  %v2162_v13 = vrot.slane %v127_v2, 4  ;;  %v102_v14 = vshll.u32 %v25_v8, 16  ;;  %v1907_v15 = vcombine.low %v2148_v6, %v25_v8  ;;  %v2168_v16 = vld [vmem:[%s3646_s0 + $0x78] sm:$0xf]  ;;  %v2170_v17 = vrot.slane %v130_v3, 5  ;;  %s2102_s30 = smov 12  }
   0x5   :  { %v2172_v18 = vrot.slane %v113_v5, 4  ;;  %v2174_v19 = vrot.slane %v116_v7, 5  ;;  %v87_v20 = vrot.slane %v85_v9, 4  ;;  %v2179_v21 = vld [vmem:[%s3646_s0 + $0x60] sm:$0xf]  ;;  %v2181_v22 = vrot.slane %v99_v11, 4 }
   0x6   :  { %1008 = vrot.lane.b32.xlu0 %v1907_v15, %s2100_s20  ;;  %v90_v23 = vrot.slane %v88_v10, 5  ;;  %v225_v24 = vshrl.u32 %v2160_v12, 16  ;;  %v2187_v25 = vcombine.low %v2160_v12, %v2168_v16  ;;  %v2192_v26 = vld [vmem:[%s3646_s0 + $0x68] sm:$0xf]  ;;  %v2194_v27 = vrot.slane %v102_v14, 5  ;;  %s2103_s10 = smov 16  }
   0x7   :  { %v228_v28 = vshll.u32 %v2160_v12, 16  ;;  %v239_v29 = vshrl.u32 %v2168_v16, 16  ;;  %v242_v30 = vshll.u32 %v2168_v16, 16  ;;  %v1911_v31 = vcombine.low %v2179_v21, %v2192_v26  ;;  %v2210_v33 = vld [vmem:[%s3646_s0 + $0x80] sm:$0xf]  ;;  %s2104_s16 = smov 20  }
   0x8   :  { %1018 = vrot.lane.b32.xlu1 %v2187_v25, %s2100_s20  ;;  %v2205_v32 = vcombine.low %v2192_v26, %v2160_v12  ;;  %v2215_v34 = vld [vmem:[%s3646_s0 + $0x28] sm:$0xf]  ;;  %v197_v36 = vshrl.u32 %v2179_v21, 16  ;;  %v200_v37 = vshll.u32 %v2179_v21, 16  ;;  %v211_v38 = vshrl.u32 %v2192_v26, 16  ;;  %s2105_s22 = smov 24  }
   0x9   :  { %v2220_v35 = vld [vmem:[%s3646_s0 + $0x88] sm:$0xf]  ;;  %v214_v39 = vshll.u32 %v2192_v26, 16  ;;  %v2227_v40 = vcombine.low %v25_v8, %v26_v0  ;;  %v253_v41 = vshrl.u32 %v2210_v33, 16  ;;  %v256_v42 = vshll.u32 %v2210_v33, 16  ;;  %s2106_s5 = smov 28  }
   0xa   :  { %3669 = vst [vmem:[#allocation6_spill] sm:$0xff] %v2205_v32  ;;  %1016 = vrot.lane.b32.xlu0 %v1911_v31, %s2100_s20  ;;  %v2234_v43 = vld [vmem:[%s3646_s0 + $0x58] sm:$0xf]  ;;  %v2239_v44 = vld [vmem:[%s3646_s0 + $0x5c] sm:$0x1]  ;;  %v2243_v45 = vcombine.low %v2168_v16, %v2210_v33  ;;  %v2246_v46 = vcombine.low %v27_v1, %v2215_v34  ;;  %v2250_v47 = vcombine.low %v2210_v33, %v2220_v35  ;;  %v199_v53 = vrot.slane %v197_v36, 4 }
   0xb   :  { %v2255_v48 = vld [vmem:[%s3646_s0 + $0x64] sm:$0x1]  ;;  %v2262_v49 = vld [vmem:[%s3646_s0 + $0x30] sm:$0xf]  ;;  %v183_v50 = vshrl.u32 %v2234_v43, 16  ;;  %v186_v51 = vshll.u32 %v2234_v43, 16  ;;  %v91_v57 = vor.u32 %v90_v23, %v87_v20 }
   0xc   :  { %3670 = vst [vmem:[#allocation7_spill] sm:$0xff] %v2243_v45  ;;  %3671 = vst [vmem:[#allocation8_spill] sm:$0xff] %v2246_v46  ;;  %1038 = vrot.lane.b32.xlu1 %v2205_v32, %s2101_s14  ;;  %v192_v52 = vshll.u32 %v2239_v44, 16  ;;  %v202_v54 = vrot.slane %v200_v37, 5  ;;  %v206_v55 = vshll.u32 %v2255_v48, 16  ;;  %v2298_v11 = vcombine.low %v2215_v34, %v2262_v49 }
   0xd   :  { %v2271_v56 = vld [vmem:[%s3646_s0] sm:$0xf]  ;;  %v185_v58 = vrot.slane %v183_v50, 4  ;;  %v188_v59 = vrot.slane %v186_v51, 5  ;;  %v2278_v61 = vld [vmem:[%s3646_s0 + $0x4] sm:$0x1] }
   0xe   :  { %3672 = vst [vmem:[#allocation9_spill] sm:$0xff] %v2271_v56  ;;  %1030 = vrot.lane.b32.xlu0 %v2227_v40, %s2101_s14  ;;  %v194_v60 = vrot.slane %v192_v52, 5  ;;  %v71_v62 = vshrl.u32 %v2271_v56, 16  ;;  %v203_v63 = vor.u32 %v202_v54, %v199_v53  ;;  %v208_v0 = vrot.slane %v206_v55, 5  ;;  %v2284_v1 = vld [vmem:[%s3646_s0 + $0xc] sm:$0x1] }
   0xf   :  { %v74_v2 = vshll.u32 %v2271_v56, 16  ;;  %v80_v3 = vshll.u32 %v2278_v61, 16  ;;  %v189_v5 = vor.u32 %v188_v59, %v185_v58  ;;  %v92_v8 = vrot.slane %v91_v57, 4  ;;  %v2294_v10 = vld [vmem:[%s3646_s0 + $0x6c] sm:$0x1] }
  0x10   :  { %1040 = vrot.lane.b32.xlu1 %v2243_v45, %s2101_s14  ;;  %v73_v7 = vrot.slane %v71_v62, 4  ;;  %v94_v9 = vshll.u32 %v2284_v1, 16  ;;  %v204_v15 = vrot.slane %v203_v63, 4  ;;  %v213_v23 = vrot.slane %v211_v38, 4  ;;  %v2311_v36 = vld [vmem:[%s3646_s0 + $0x74] sm:$0x1] }
  0x11   :  { %v76_v20 = vrot.slane %v74_v2, 5  ;;  %v190_v26 = vrot.slane %v189_v5, 4  ;;  %v216_v37 = vrot.slane %v214_v39, 5  ;;  %v220_v50 = vshll.u32 %v2294_v10, 16  ;;  %v2321_v54 = vld [vmem:[%s3646_s0 + $0x14] sm:$0x1] }
  0x12   :  { %1032 = vrot.lane.b32.xlu0 %v2246_v46, %s2101_s14  ;;  %v96_v31 = vrot.slane %v94_v9, 5  ;;  %v82_v52 = vrot.slane %v80_v3, 5  ;;  %v227_v53 = vrot.slane %v225_v24, 4  ;;  %v230_v38 = vrot.slane %v228_v28, 5  ;;  %v2338_v28 = vld [vmem:[%s3646_s0 + $0x1c] sm:$0x1] }
  0x13   :  { %v77_v51 = vor.u32 %v76_v20, %v73_v7  ;;  %v195_v39 = vsel %vm2302_vm2, %v190_v26, %v194_v60  ;;  %v2329_v55 = vsel %vm2302_vm2, %v204_v15, %v208_v0  ;;  %v217_v24 = vor.u32 %v216_v37, %v213_v23  ;;  %v2367_v23 = vld [vmem:[%s3646_s0 + $0x24] sm:$0x1] }
  0x14   :  { %1060 = vrot.lane.b32.xlu1 %v2187_v25, %s2102_s30  ;;  %v2333_v12 = vsel %vm2302_vm2, %v92_v8, %v96_v31  ;;  %v222_v58 = vrot.slane %v220_v50, 5  ;;  %v231_v25 = vor.u32 %v230_v38, %v227_v53  ;;  %v234_v59 = vshll.u32 %v2311_v36, 16 }
  0x15   :  { %v78_v57 = vrot.slane %v77_v51, 4  ;;  %v218_v60 = vrot.slane %v217_v24, 4  ;;  %v105_v62 = vor.u32 %v2194_v27, %v2181_v22  ;;  %v108_v63 = vshll.u32 %v2321_v54, 16 }
  0x16   :  { %1052 = vrot.lane.b32.xlu0 %v2143_v4, %s2102_s30  ;;  %v119_v0 = vor.u32 %v2174_v19, %v2172_v18  ;;  %v232_v3 = vrot.slane %v231_v25, 4  ;;  %v236_v5 = vrot.slane %v234_v59, 5  ;;  %v122_v7 = vshll.u32 %v2338_v28, 16  ;;  %v2358_v18 = vld [vmem:[%s3646_s0 + $0x7c] sm:$0x1] }
  0x17   :  { %v83_v2 = vsel %vm2302_vm2, %v78_v57, %v82_v52  ;;  %v141_v8 = vshrl.u32 %v2215_v34, 16  ;;  %v1923_v4 = vcombine.low %v195_v39, %v2329_v55  ;;  %v106_v22 = vrot.slane %v105_v62, 4 }
  0x18   :  { %1062 = vrot.lane.b32.xlu1 %v2250_v47, %s2102_s30  ;;  %v110_v27 = vrot.slane %v108_v63, 5  ;;  %v223_v19 = vsel %vm2302_vm2, %v218_v60, %v222_v58  ;;  %v237_v9 = vsel %vm2302_vm2, %v232_v3, %v236_v5  ;;  %v120_v15 = vrot.slane %v119_v0, 4 }
  0x19   :  { %v124_v20 = vrot.slane %v122_v7, 5  ;;  %v144_v26 = vshll.u32 %v2215_v34, 16  ;;  %v1919_v31 = vcombine.low %v83_v2, %v2333_v12  ;;  %v241_v37 = vrot.slane %v239_v29, 4 }
  0x1a   :  { %1054 = vrot.lane.b32.xlu0 %v2298_v11, %s2102_s30  ;;  %v244_v50 = vrot.slane %v242_v30, 5  ;;  %v111_v51 = vsel %vm2302_vm2, %v106_v22, %v110_v27  ;;  %v248_v53 = vshll.u32 %v2358_v18, 16  ;;  %v133_v34 = vor.u32 %v2170_v17, %v2162_v13  ;;  %v2394_v13 = vld [vmem:[%s3646_s0 + $0x84] sm:$0x1] }
  0x1b   :  { %v125_v52 = vsel %vm2302_vm2, %v120_v15, %v124_v20  ;;  %v1924_v38 = vcombine.low %v223_v19, %v237_v9  ;;  %v136_v29 = vshll.u32 %v2367_v23, 16  ;;  %v255_v30 = vrot.slane %v253_v41, 4 }
  0x1c   :  { %1100 = vrot.lane.b32.xlu1 %v1923_v4, %s2103_s10  ;;  %v245_v39 = vor.u32 %v244_v50, %v241_v37  ;;  %v250_v16 = vrot.slane %v248_v53, 5  ;;  %v258_v24 = vrot.slane %v256_v42, 5  ;;  %v1920_v57 = vcombine.low %v111_v51, %v125_v52  ;;  %v2403_v42 = vld [vmem:[%s3646_s0 + $0x2c] sm:$0x1] }
  0x1d   :  { %v134_v17 = vrot.slane %v133_v34, 4  ;;  %v138_v25 = vrot.slane %v136_v29, 5  ;;  %v143_v59 = vrot.slane %v141_v8, 4  ;;  %v146_v60 = vrot.slane %v144_v26, 5  ;;  %v2427_v34 = vld [vmem:[%s3646_s0 + $0x34] sm:$0x1] }
  0x1e   :  { %1092 = vrot.lane.b32.xlu0 %v1919_v31, %s2103_s10  ;;  %v246_v58 = vrot.slane %v245_v39, 4  ;;  %v267_v62 = vshrl.u32 %v2220_v35, 16  ;;  %v270_v41 = vshll.u32 %v2220_v35, 16  ;;  %v1931_v33 = vcombine.low %v2329_v55, %v223_v19 }
  0x1f   :  { %v259_v0 = vor.u32 %v258_v24, %v255_v30  ;;  %v262_v2 = vshll.u32 %v2394_v13, 16  ;;  %v155_v3 = vshrl.u32 %v2262_v49, 16  ;;  %v1927_v5 = vcombine.low %v2333_v12, %v111_v51  ;;  %v2419_v12 = vld [vmem:[%s3646_s0 + $0x8c] sm:$0x1] }
  0x20   :  { %1102 = vrot.lane.b32.xlu1 %v1924_v38, %s2103_s10  ;;  %v251_v63 = vsel %vm2302_vm2, %v246_v58, %v250_v16  ;;  %v158_v7 = vshll.u32 %v2262_v49, 16  ;;  %v139_v55 = vsel %vm2302_vm2, %v134_v17, %v138_v25  ;;  %v147_v8 = vor.u32 %v146_v60, %v143_v59  ;;  %v2444_v25 = vld [vmem:[%s3646_s0 + $0x58] sm:$0xe]  ;;  %v2449_v59 = vld [vmem:[%s3646_s0 + $0x60] sm:$0xe] }
  0x21   :  { %v150_v4 = vshll.u32 %v2403_v42, 16  ;;  %v1932_v22 = vcombine.low %v237_v9, %v251_v63  ;;  %v269_v27 = vrot.slane %v267_v62, 4  ;;  %v272_v19 = vrot.slane %v270_v41, 5  ;;  %v2465_v41 = vld [vmem:[%s3646_s0 + $0x8] sm:$0xe] }
  0x22   :  { %1094 = vrot.lane.b32.xlu0 %v1920_v57, %s2103_s10  ;;  %v260_v15 = vrot.slane %v259_v0, 4  ;;  %v264_v20 = vrot.slane %v262_v2, 5  ;;  %v1928_v26 = vcombine.low %v125_v52, %v139_v55  ;;  %v148_v31 = vrot.slane %v147_v8, 4 }
  0x23   :  { %v152_v37 = vrot.slane %v150_v4, 5  ;;  %v157_v50 = vrot.slane %v155_v3, 4  ;;  %v160_v51 = vrot.slane %v158_v7, 5  ;;  %v273_v53 = vor.u32 %v272_v19, %v269_v27 }
  0x24   :  { %1126 = vrot.lane.b32.xlu1 %v1931_v33, %s2104_s16  ;;  %v276_v9 = vshll.u32 %v2419_v12, 16  ;;  %v265_v39 = vsel %vm2302_vm2, %v260_v15, %v264_v20  ;;  %v164_v16 = vshll.u32 %v2427_v34, 16  ;;  %vm432_vm3 = vcmask 1042432   ;;  %v2514_v20 = vld [vmem:[%s3646_s0 + $0x10] sm:$0xe] }
  0x25   :  { %v153_v52 = vsel %vm2302_vm2, %v148_v31, %v152_v37  ;;  %v161_v29 = vor.u32 %v160_v51, %v157_v50  ;;  %v2436_v30 = vcombine.low %v251_v63, %v265_v39  ;;  %v274_v24 = vrot.slane %v273_v53, 4  ;;  %v2521_v31 = vld [vmem:[%s3646_s0 + $0x18] sm:$0xe] }
  0x26   :  { %1118 = vrot.lane.b32.xlu0 %v1927_v5, %s2104_s16  ;;  %v278_v58 = vrot.slane %v276_v9, 5  ;;  %v2439_v17 = vcombine.low %v139_v55, %v153_v52  ;;  %vm433_vm4 = vcmask 1046532   ;;  %v1885_v33 = vrot.slane %v2444_v25, 9 }
  0x27   :  { %v162_v60 = vrot.slane %v161_v29, 4  ;;  %v469_v63 = vrot.slane %v2239_v44, 5  ;;  %v1886_v0 = vrot.slane %v2449_v59, 9  ;;  %v473_v2 = vrot.slane %v2255_v48, 5  ;;  %vm2473_vm5 = vmor %vm432_vm3, %vm433_vm4 }
  0x28   :  { %1128 = vrot.lane.b32.xlu1 %v1932_v22, %s2104_s16  ;;  %v2460_v62 = vsel %vm2302_vm2, %v274_v24, %v278_v58  ;;  %v3675_v3 = vmov 0  ;;  %v437_v55 = vrot.slane %v2278_v61, 5  ;;  %v1878_v44 = vrot.slane %v2465_v41, 9 }
  0x29   :  { %v3676_v3 = vsel %vm2473_vm5, 4294967295, %v3675_v3  ;;  %v441_v8 = vrot.slane %v2284_v1, 5  ;;  %v2487_v48 = vcombine.low %v265_v39, %v2460_v62  ;;  %v470_v4 = vsel %vm2473_vm5, %v1885_v33, %v469_v63  ;;  %v2500_v1 = vld [vmem:[%s3646_s0 + $0x68] sm:$0xe] }
  0x2a   :  { %1120 = vrot.lane.b32.xlu0 %v1928_v26, %s2104_s16  ;;  %3677 = vst [vmem:[#allocation10_spill] sm:$0xff] %v3676_v3  ;;  %v474_v27 = vsel %vm2473_vm5, %v1886_v0, %v473_v2  ;;  %v1887_v37 = vrot.slane %v2500_v1, 9  ;;  %v477_v50 = vrot.slane %v2294_v10, 5  ;;  %v481_v53 = vrot.slane %v2311_v36, 5 }
  0x2b   :  { %v442_v15 = vsel %vm2473_vm5, %v1878_v44, %v441_v8 }
  0x2c   :  { %1146 = vrot.lane.b32.xlu1 %v1924_v38, %s2105_s22  ;;  %v166_v38 = vrot.slane %v164_v16, 5 }
  0x2e   :  { %1138 = vrot.lane.b32.xlu0 %v1920_v57, %s2105_s22  ;;  %v2454_v57 = vld [vmem:[%s3646_s0] sm:$0xe]  ;;  %v2480_v7 = vsel %vm2302_vm2, %v162_v60, %v166_v38 }
  0x2f   :  { %v1877_v5 = vrot.slane %v2454_v57, 9  ;;  %v2495_v61 = vcombine.low %v153_v52, %v2480_v7 }
  0x30   :  { %1148 = vrot.lane.b32.xlu1 %v2436_v30, %s2105_s22 }
  0x31   :  { %v438_v19 = vsel %vm2473_vm5, %v1877_v5, %v437_v55 }
  0x32   :  { %1140 = vrot.lane.b32.xlu0 %v2439_v17, %s2105_s22 }
  0x34   :  { %1166 = vrot.lane.b32.xlu1 %v1932_v22, %s2106_s5  ;;  %v2505_v22 = vld [vmem:[%s3646_s0 + $0x70] sm:$0xe] }
  0x35   :  { %v1888_v51 = vrot.slane %v2505_v22, 9 }
  0x36   :  { %1158 = vrot.lane.b32.xlu0 %v1928_v26, %s2106_s5  ;;  %v1943_v26 = vcombine.low %v470_v4, %v474_v27 }
  0x38   :  { %1168 = vrot.lane.b32.xlu1 %v2487_v48, %s2106_s5 }
  0x39   :  { %8 = vsyncpa [#allocation3], 0  ;;  %v1939_v9 = vcombine.low %v438_v19, %v442_v15  ;;  %v1879_v39 = vrot.slane %v2514_v20, 9  ;;  %v445_v52 = vrot.slane %v2321_v54, 5  ;;  %v1880_v29 = vrot.slane %v2521_v31, 9  ;;  %s2107_s17 = smov 32  }
  0x3a   :  { %1160 = vrot.lane.b32.xlu0 %v2495_v61, %s2106_s5  ;;  %v449_v16 = vrot.slane %v2338_v28, 5  ;;  %v478_v36 = vsel %vm2473_vm5, %v1887_v37, %v477_v50  ;;  %v482_v24 = vsel %vm2473_vm5, %v1888_v51, %v481_v53  ;;  %v2553_v33 = vld [vmem:[%s3646_s0 + $0x90] sm:$0xf]  ;;  %v2558_v63 = vld [vmem:[%s3646_s0 + $0x98] sm:$0xf]  ;;  %s2108_s4 = smov 36  }
  0x3b   :  { %v446_v54 = vsel %vm2473_vm5, %v1879_v39, %v445_v52  ;;  %v1944_v58 = vcombine.low %v478_v36, %v482_v24  ;;  %v1951_v38 = vcombine.low %v474_v27, %v478_v36  ;;  %v2571_v2 = vld [vmem:[%s3646_s0 + $0x38] sm:$0xf]  ;;  %v2576_v5 = vld [vmem:[%s3646_s0 + $0x40] sm:$0xf]  ;;  %v2581_v55 = vcombine.low %v2553_v33, %v2558_v63  ;;  %v2625_v51 = vld [vmem:[%s3646_s0 + $0x28] sm:$0xe] }
  0x3c   :  { %1206 = vrot.lane.b32.xlu1 %v1943_v26, %s2107_s17  ;;  %v450_v28 = vsel %vm2473_vm5, %v1880_v29, %v449_v16  ;;  %v2586_v44 = vld [vmem:[%s3646_s0 + $0x20] sm:$0xe]  ;;  %v485_v4 = vrot.slane %v2358_v18, 5  ;;  %v2593_v27 = vcombine.low %v2571_v2, %v2576_v5  ;;  %v2601_v26 = vcombine.low %v2220_v35, %v2553_v33  ;;  %v2645_v16 = vld [vmem:[%s3646_s0 + $0x48] sm:$0xf]  ;;  %s2109_s26 = smov 40  }
  0x3d   :  { %v1940_v60 = vcombine.low %v446_v54, %v450_v28  ;;  %v1881_v19 = vrot.slane %v2586_v44, 9  ;;  %v2609_v37 = vcombine.low %v2262_v49, %v2571_v2  ;;  %v2620_v35 = vld [vmem:[%s3646_s0 + $0x80] sm:$0xe]  ;;  %v1882_v39 = vrot.slane %v2625_v51, 9  ;;  %s2110_s24 = smov 44   ;;  %s2113_s12 = smov 56  }
  0x3e   :  { %1198 = vrot.lane.b32.xlu0 %v1939_v9, %s2107_s17  ;;  %3678 = vst [vmem:[#allocation11_spill] sm:$0xff] %v2601_v26  ;;  %v1890_v53 = vrot.slane %v2620_v35, 9  ;;  %v489_v9 = vrot.slane %v2394_v13, 5  ;;  %v457_v52 = vrot.slane %v2403_v42, 5  ;;  %v2640_v29 = vld [vmem:[%s3646_s0 + $0xa0] sm:$0xf] }
  0x3f   :  { %3679 = vst [vmem:[#allocation12_spill] sm:$0xff] %v2609_v37  ;;  %v705_v36 = vshrl.u32 %v2444_v25, 16  ;;  %v546_v13 = vld [vmem:[%s3646_s0 + $0x5c] sm:$0x3]  ;;  %v723_v42 = vshrl.u32 %v2449_v59, 16  ;;  %v564_v46 = vshll.u32 %v2454_v57, 16 }
  0x40   :  { %1020 = vrot.lane.b32.xlu1 %v2250_v47, %s2100_s20  ;;  %v1947_v47 = vcombine.low %v442_v15, %v446_v54  ;;  %v453_v15 = vrot.slane %v2367_v23, 5  ;;  %v726_v54 = vshll.u32 %v2449_v59, 16  ;;  %v2670_v59 = vsel %vm2473_vm5, %v1882_v39, %v457_v52 }
  0x41   :  { %v169_v52 = vshrl.u32 %v2571_v2, 16  ;;  %v566_v39 = vrot.slane %v564_v46, 6  ;;  %vm557_vm6 = vsmask.f32 2304  ;;  %vm558_vm7 = vsmask.f32 6416 }
  0x42   :  { %1012 = vrot.lane.b32.xlu0 %v2298_v11, %s2100_s20  ;;  %v2564_v11 = vld [vmem:[%s3646_s0 + $0x78] sm:$0xe]  ;;  %v454_v23 = vsel %vm2473_vm5, %v1881_v19, %v453_v15  ;;  %v714_v19 = vshrl.u32 %v546_v13, 16  ;;  %v717_v15 = vshll.u32 %v546_v13, 16  ;;  %v728_v10 = vrot.slane %v726_v54, 6  ;;  %vm2715_vm8 = vmor %vm557_vm6, %vm558_vm7 }
  0x43   :  { %v1889_v8 = vrot.slane %v2564_v11, 9  ;;  %v2629_v49 = vcombine.low %v450_v28, %v454_v23  ;;  %v547_v28 = vld [vmem:[%s3646_s0 + $0x64] sm:$0x3]  ;;  %v582_v45 = vshll.u32 %v2465_v41, 16  ;;  %v536_v46 = vld [vmem:[%s3646_s0 + $0xc] sm:$0x3] }
  0x44   :  { %1208 = vrot.lane.b32.xlu1 %v1944_v58, %s2107_s17  ;;  %v732_v0 = vshrl.u32 %v547_v28, 16  ;;  %v719_v13 = vrot.slane %v717_v15, 6  ;;  %vm1386_vm9 = vcmask 31744   ;;  %vm1411_vm10 = vcmask 64512  }
  0x45   :  { %v486_v18 = vsel %vm2473_vm5, %v1889_v8, %v485_v4  ;;  %v707_v8 = vrot.slane %v705_v36, 5  ;;  %v584_v56 = vrot.slane %v582_v45, 6  ;;  %v2733_v45 = vld [vmem:[%s3646_s0 + $0x50] sm:$0xf]  ;;  %vm1428_vm11 = vcmask 97280  }
  0x46   :  { %1200 = vrot.lane.b32.xlu0 %v1940_v60, %s2107_s17  ;;  %v2615_v50 = vcombine.low %v482_v24, %v486_v18  ;;  %v708_v24 = vshll.u32 %v2444_v25, 16  ;;  %v1916_v25 = vcombine.low %v2558_v63, %v2640_v29  ;;  %vm1445_vm12 = vcmask 130048  }
  0x47   :  { %vm1462_vm13 = vcmask 162816   ;;  %vm1479_vm14 = vcmask 195584   ;;  %vm1496_vm15 = vcmask 228352   ;;  %vm1513_vm0 = vcmask 261120  }
  0x48   :  { %1232 = vrot.lane.b32.xlu1 %v1951_v38, %s2108_s4  ;;  %v1915_v38 = vcombine.low %v2576_v5, %v2645_v16  ;;  %v710_v4 = vrot.slane %v708_v24, 6  ;;  %v2687_v24 = vcombine.low %v454_v23, %v2670_v59  ;;  %vm1530_vm1 = vcmask 293888  }
  0x49   :  { %vm1564_vm3 = vcmask 359424   ;;  %vm1581_vm4 = vcmask 392192   ;;  %vm1615_vm6 = vcmask 457728   ;;  %vm1632_vm7 = vcmask 490496  }
  0x4a   :  { %1224 = vrot.lane.b32.xlu0 %v1947_v47, %s2108_s4  ;;  %v2666_v47 = vsel %vm2473_vm5, %v1890_v53, %v489_v9  ;;  %v281_v53 = vshrl.u32 %v2553_v33, 16  ;;  %v284_v9 = vshll.u32 %v2553_v33, 16  ;;  %3680 = vst [vmem:[#allocation13_spill] sm:$0xff] %v2687_v24  ;;  %v2693_v33 = vld [vmem:[%s3646_s0 + $0x88] sm:$0xe]  ;;  %v711_v54 = vor.u32 %v710_v4, %v707_v8 }
  0x4b   :  { %v2684_v36 = vcombine.low %v486_v18, %v2666_v47  ;;  %v1891_v32 = vrot.slane %v2693_v33, 9  ;;  %v493_v8 = vrot.slane %v2419_v12, 5 }
  0x4c   :  { %1022 = vrot.lane.b32.xlu1 %v2581_v55, %s2100_s20 }
  0x4e   :  { %1014 = vrot.lane.b32.xlu0 %v2593_v27, %s2100_s20 }
  0x50   :  { %1042 = vrot.lane.b32.xlu1 %v2601_v26, %s2101_s14  ;;  %v561_v26 = vshrl.u32 %v2454_v57, 16  ;;  %v716_v57 = vrot.slane %v714_v19, 5 }
  0x52   :  { %1034 = vrot.lane.b32.xlu0 %v2609_v37, %s2101_s14  ;;  %v735_v37 = vshll.u32 %v547_v28, 16  ;;  %v734_v28 = vrot.slane %v732_v0, 5  ;;  %v563_v23 = vrot.slane %v561_v26, 5  ;;  %v461_v0 = vrot.slane %v2427_v34, 5 }
  0x53   :  { %v720_v26 = vor.u32 %v719_v13, %v716_v57 }
  0x54   :  { %1234 = vrot.lane.b32.xlu1 %v2615_v50, %s2108_s4 }
  0x56   :  { %1226 = vrot.lane.b32.xlu0 %v2629_v49, %s2108_s4 }
  0x58   :  { %1252 = vrot.lane.b32.xlu1 %v1944_v58, %s2109_s26  ;;  %v725_v58 = vrot.slane %v723_v42, 5  ;;  %v2698_v42 = vld [vmem:[%s3646_s0 + $0x30] sm:$0xe] }
  0x5a   :  { %1244 = vrot.lane.b32.xlu0 %v1940_v60, %s2109_s26  ;;  %v535_v60 = vld [vmem:[%s3646_s0 + $0x4] sm:$0x3]  ;;  %v729_v18 = vor.u32 %v728_v10, %v725_v58  ;;  %v1883_v10 = vrot.slane %v2698_v42, 9  ;;  %v567_v58 = vor.u32 %v566_v39, %v563_v23  ;;  %v286_v39 = vrot.slane %v284_v9, 5  ;;  %v2754_v23 = vld [vmem:[%s3646_s0 + $0x94] sm:$0x1] }
  0x5b   :  { %v570_v19 = vshrl.u32 %v535_v60, 16  ;;  %v573_v15 = vshll.u32 %v535_v60, 16 }
  0x5c   :  { %1044 = vrot.lane.b32.xlu1 %v1916_v25, %s2101_s14  ;;  %v737_v25 = vrot.slane %v735_v37, 6  ;;  %v730_v37 = vrot.slane %v729_v18, 4  ;;  %v283_v18 = vrot.slane %v281_v53, 4 }
  0x5d   :  { %v572_v34 = vrot.slane %v570_v19, 5  ;;  %v575_v60 = vrot.slane %v573_v15, 6  ;;  %v568_v19 = vrot.slane %v567_v58, 4  ;;  %v2759_v15 = vld [vmem:[%s3646_s0 + $0x3c] sm:$0x1]  ;;  %v290_v58 = vshll.u32 %v2754_v23, 16 }
  0x5e   :  { %1036 = vrot.lane.b32.xlu0 %v1915_v38, %s2101_s14  ;;  %v579_v38 = vshrl.u32 %v2465_v41, 16  ;;  %v738_v4 = vor.u32 %v737_v25, %v734_v28  ;;  %v172_v41 = vshll.u32 %v2571_v2, 16  ;;  %v2726_v2 = vld [vmem:[%s3646_s0 + $0xa8] sm:$0xf]  ;;  %v2737_v28 = vsel %vm2473_vm5, %v1891_v32, %v493_v8 }
  0x5f   :  { %3683 = vst [vmem:[#allocation14_spill] sm:$0xff] %v2737_v28  ;;  %v2741_v25 = vsel %vm2473_vm5, %v1883_v10, %v461_v0  ;;  %v576_v32 = vor.u32 %v575_v60, %v572_v34  ;;  %v1918_v10 = vcombine.low %v2640_v29, %v2726_v2  ;;  %v744_v60 = vshll.u32 %v2500_v1, 16 }
  0x60   :  { %1064 = vrot.lane.b32.xlu1 %v2581_v55, %s2102_s30  ;;  %v712_v55 = vrot.slane %v711_v54, 4  ;;  %v581_v6 = vrot.slane %v579_v38, 5  ;;  %v591_v54 = vshll.u32 %v536_v46, 16  ;;  %3684 = vst [vmem:[#allocation15_spill] sm:$0xff] %v2741_v25  ;;  %v2749_v9 = vsel %vm2715_vm8, %v730_v37, %v738_v4 }
  0x61   :  { %v171_v38 = vrot.slane %v169_v52, 4  ;;  %v174_v8 = vrot.slane %v172_v41, 5  ;;  %v1917_v37 = vcombine.low %v2645_v16, %v2733_v45  ;;  %v287_v4 = vor.u32 %v286_v39, %v283_v18 }
  0x62   :  { %1056 = vrot.lane.b32.xlu0 %v2593_v27, %s2102_s30  ;;  %v588_v27 = vshrl.u32 %v536_v46, 16  ;;  %v2745_v53 = vsel %vm2715_vm8, %v712_v55, %v720_v26  ;;  %v585_v0 = vor.u32 %v584_v56, %v581_v6  ;;  %v593_v55 = vrot.slane %v591_v54, 6 }
  0x63   :  { %v2777_v6 = vcombine.low %v2670_v59, %v2741_v25  ;;  %v178_v52 = vshll.u32 %v2759_v15, 16  ;;  %v2784_v41 = vsel %vm2715_vm8, %v568_v19, %v576_v32  ;;  %v175_v34 = vor.u32 %v174_v8, %v171_v38  ;;  %v549_v32 = vld [vmem:[%s3646_s0 + $0x74] sm:$0x3] }
  0x64   :  { %1254 = vrot.lane.b32.xlu1 %v2684_v36, %s2109_s26  ;;  %v590_v46 = vrot.slane %v588_v27, 5  ;;  %v586_v59 = vrot.slane %v585_v0, 4  ;;  %v759_v54 = vshrl.u32 %v2505_v22, 16  ;;  %v762_v18 = vshll.u32 %v2505_v22, 16  ;;  %v537_v0 = vld [vmem:[%s3646_s0 + $0x14] sm:$0x3] }
  0x65   :  { %3686 = vst [vmem:[#allocation17_spill] sm:$0xff] %v2777_v6  ;;  %v288_v39 = vrot.slane %v287_v4, 4  ;;  %v292_v19 = vrot.slane %v290_v58, 5  ;;  %v597_v38 = vshrl.u32 %v2514_v20, 16  ;;  %v600_v8 = vshll.u32 %v2514_v20, 16 }
  0x66   :  { %1246 = vrot.lane.b32.xlu0 %v2687_v24, %s2109_s26  ;;  %v594_v27 = vor.u32 %v593_v55, %v590_v46  ;;  %v615_v22 = vshrl.u32 %v2521_v31, 16  ;;  %v618_v46 = vshll.u32 %v2521_v31, 16  ;;  %v176_v55 = vrot.slane %v175_v34, 4  ;;  %v538_v20 = vld [vmem:[%s3646_s0 + $0x1c] sm:$0x3] }
  0x67   :  { %v746_v58 = vrot.slane %v744_v60, 6  ;;  %v768_v13 = vshrl.u32 %v549_v32, 16  ;;  %v771_v57 = vshll.u32 %v549_v32, 16  ;;  %v599_v56 = vrot.slane %v597_v38, 5 }
  0x68   :  { %1272 = vrot.lane.b32.xlu1 %v2615_v50, %s2110_s24  ;;  %v2773_v50 = vcombine.low %v2666_v47, %v2737_v28  ;;  %v741_v47 = vshrl.u32 %v2500_v1, 16  ;;  %v180_v1 = vrot.slane %v178_v52, 5  ;;  %v764_v52 = vrot.slane %v762_v18, 6 }
  0x69   :  { %v602_v25 = vrot.slane %v600_v8, 6  ;;  %v606_v28 = vshrl.u32 %v537_v0, 16  ;;  %v609_v24 = vshll.u32 %v537_v0, 16  ;;  %v617_v31 = vrot.slane %v615_v22, 5 }
  0x6a   :  { %1264 = vrot.lane.b32.xlu0 %v2629_v49, %s2110_s24  ;;  %3685 = vst [vmem:[#allocation16_spill] sm:$0xff] %v2773_v50  ;;  %v548_v49 = vld [vmem:[%s3646_s0 + $0x6c] sm:$0x3]  ;;  %v743_v4 = vrot.slane %v741_v47, 5  ;;  %v620_v34 = vrot.slane %v618_v46, 6  ;;  %v627_v47 = vshll.u32 %v538_v20, 16  ;;  %v2814_v60 = vsel %vm2715_vm8, %v586_v59, %v594_v27 }
  0x6b   :  { %v753_v26 = vshll.u32 %v548_v49, 16  ;;  %v770_v8 = vrot.slane %v768_v13, 5  ;;  %v773_v59 = vrot.slane %v771_v57, 6  ;;  %v603_v27 = vor.u32 %v602_v25, %v599_v56 }
  0x6c   :  { %1066 = vrot.lane.b32.xlu1 %v1918_v10, %s2102_s30  ;;  %v750_v10 = vshrl.u32 %v548_v49, 16  ;;  %v624_v49 = vshrl.u32 %v538_v20, 16  ;;  %v608_v22 = vrot.slane %v606_v28, 5  ;;  %v611_v46 = vrot.slane %v609_v24, 6 }
  0x6d   :  { %v755_v32 = vrot.slane %v753_v26, 6  ;;  %v3687_v24 = vcombine.low %v2745_v53, %v2749_v9  ;;  %v3688_v56 = vshrl.u32 %v2558_v63, 16 }
  0x6e   :  { %1058 = vrot.lane.b32.xlu0 %v1917_v37, %s2102_s30  ;;  %v761_v37 = vrot.slane %v759_v54, 5  ;;  %v2822_v54 = vsel %vm2302_vm2, %v176_v55, %v180_v1  ;;  %v752_v18 = vrot.slane %v750_v10, 5  ;;  %v626_v1 = vrot.slane %v624_v49, 5  ;;  %s2111_s30 = smov 48  }
  0x6f   :  { %v629_v10 = vrot.slane %v627_v47, 6  ;;  %v2838_v13 = vcombine.low %v2480_v7, %v2822_v54  ;;  %v604_v7 = vrot.slane %v603_v27, 4  ;;  %v612_v20 = vor.u32 %v611_v46, %v608_v22  ;;  %v550_v27 = vld [vmem:[%s3646_s0 + $0x7c] sm:$0x3] }
  0x70   :  { %1104 = vrot.lane.b32.xlu1 %v2436_v30, %s2103_s10  ;;  %v2818_v30 = vsel %vm2302_vm2, %v288_v39, %v292_v19  ;;  %v765_v38 = vor.u32 %v764_v52, %v761_v37  ;;  %v1959_v39 = vcombine.low %v2784_v41, %v2814_v60  ;;  %v621_v19 = vor.u32 %v620_v34, %v617_v31  ;;  %v2853_v37 = vld [vmem:[%s3646_s0 + $0x9c] sm:$0x1] }
  0x71   :  { %v2834_v26 = vcombine.low %v2460_v62, %v2818_v30  ;;  %v756_v25 = vor.u32 %v755_v32, %v752_v18  ;;  %v311_v41 = vrot.slane %v3688_v56, 4  ;;  %v3689_v62 = vshll.u32 %v2558_v63, 16  ;;  %3690 = vst [vmem:[#allocation18_spill] sm:$0xff] %v2853_v37  ;;  %v2861_v63 = vld [vmem:[%s3646_s0 + $0x44] sm:$0x1] }
  0x72   :  { %1096 = vrot.lane.b32.xlu0 %v2439_v17, %s2103_s10  ;;  %v747_v17 = vor.u32 %v746_v58, %v743_v4  ;;  %v766_v4 = vrot.slane %v765_v38, 4  ;;  %v774_v58 = vor.u32 %v773_v59, %v770_v8  ;;  %v622_v52 = vrot.slane %v621_v19, 4  ;;  %3691 = vst [vmem:[#allocation19_spill] sm:$0xff] %v2861_v63 }
  0x73   :  { %v314_v55 = vrot.slane %v3689_v62, 5  ;;  %v630_v31 = vor.u32 %v629_v10, %v626_v1  ;;  %v3692_v34 = vshrl.u32 %v2576_v5, 16  ;;  %v3693_v47 = vshll.u32 %v2576_v5, 16  ;;  %v539_v62 = vld [vmem:[%s3646_s0 + $0x24] sm:$0x3] }
  0x74   :  { %1274 = vrot.lane.b32.xlu1 %v2773_v50, %s2110_s24  ;;  %v748_v28 = vrot.slane %v747_v17, 4  ;;  %v777_v17 = vshrl.u32 %v2564_v11, 16  ;;  %v780_v32 = vshll.u32 %v2564_v11, 16  ;;  %v318_v59 = vshll.u32 %v2853_v37, 16 }
  0x75   :  { %v297_v49 = vrot.slane %v3692_v34, 4  ;;  %v300_v18 = vrot.slane %v3693_v47, 5  ;;  %v315_v8 = vor.u32 %v314_v55, %v311_v41  ;;  %v2881_v22 = vsel %vm2715_vm8, %v766_v4, %v774_v58 }
  0x76   :  { %v2826_v0 = vpop.permute.xlu1 %1010  ;;  %1266 = vrot.lane.b32.xlu0 %v2777_v6, %s2110_s24  ;;  %v757_v5 = vsel %vm2715_vm8, %v748_v28, %v756_v25  ;;  %v613_v11 = vsel %vm2715_vm8, %v604_v7, %v612_v20  ;;  %v304_v46 = vshll.u32 %v2861_v63, 16  ;;  %v2892_v19 = vsel %vm2715_vm8, %v622_v52, %v630_v31 }
  0x77   :  { %v301_v1 = vor.u32 %v300_v18, %v297_v49  ;;  %v633_v10 = vshrl.u32 %v2586_v44, 16  ;;  %v779_v28 = vrot.slane %v777_v17, 5  ;;  %v782_v25 = vrot.slane %v780_v32, 6 }
  0x78   :  { %v2840_v57 = vpop.permute.xlu0 %1008  ;;  %1312 = vrot.lane.b32.xlu1 %v3687_v24, %s2111_s30  ;;  %v636_v24 = vshll.u32 %v2586_v44, 16  ;;  %v786_v56 = vshrl.u32 %v550_v27, 16  ;;  %v789_v41 = vshll.u32 %v550_v27, 16  ;;  %v2904_v4 = vcombine.low %v757_v5, %v2881_v22 }
  0x79   :  { %v316_v58 = vrot.slane %v315_v8, 4  ;;  %v320_v7 = vrot.slane %v318_v59, 5  ;;  %v337_v44 = vshrl.u32 %v2640_v29, 16  ;;  %v340_v20 = vshll.u32 %v2640_v29, 16 }
  0x7a   :  { %1304 = vrot.lane.b32.xlu0 %v1959_v39, %s2111_s30  ;;  %v2856_v53 = vpop.permute.xlu1 %1018  ;;  %v2909_v52 = vcombine.low %v613_v11, %v2892_v19  ;;  %v306_v31 = vrot.slane %v304_v46, 5  ;;  %v635_v49 = vrot.slane %v633_v10, 5  ;;  %v642_v47 = vshrl.u32 %v539_v62, 16 }
  0x7b   :  { %v645_v18 = vshll.u32 %v539_v62, 16  ;;  %v302_v17 = vrot.slane %v301_v1, 4  ;;  %v783_v32 = vor.u32 %v782_v25, %v779_v28  ;;  %v788_v8 = vrot.slane %v786_v56, 5 }
  0x7c   :  { %v2869_v38 = vpop.permute.xlu0 %1016  ;;  %1106 = vrot.lane.b32.xlu1 %v2834_v26, %s2103_s10  ;;  %v791_v59 = vrot.slane %v789_v41, 6  ;;  %v323_v27 = vshrl.u32 %v2645_v16, 16  ;;  %v326_v29 = vshll.u32 %v2645_v16, 16  ;;  %v2924_v46 = vsel %vm2302_vm2, %v316_v58, %v320_v7  ;;  %v2950_v7 = vld [vmem:[%s3646_s0 + $0x4c] sm:$0x1] }
  0x7d   :  { %v1967_v10 = vcombine.low %v2814_v60, %v613_v11  ;;  %v644_v16 = vrot.slane %v642_v47, 5  ;;  %v647_v28 = vrot.slane %v645_v18, 6  ;;  %v2933_v25 = vcombine.low %v2818_v30, %v2924_v46  ;;  %v2945_v60 = vld [vmem:[%s3646_s0 + $0xa4] sm:$0x1]  ;;  %3695 = vst [vmem:[#allocation21_spill] sm:$0xff] %v2950_v7 }
  0x7e   :  { %1098 = vrot.lane.b32.xlu0 %v2838_v13, %s2103_s10  ;;  %v2888_v39 = vpop.permute.xlu1 %1038  ;;  %v792_v56 = vor.u32 %v791_v59, %v788_v8  ;;  %s2112_s10 = smov 52   ;;  %3694 = vst [vmem:[#allocation20_spill] sm:$0xff] %v2945_v60  ;;  %v339_v11 = vrot.slane %v337_v44, 4  ;;  %v342_v62 = vrot.slane %v340_v20, 5  ;;  %v325_v30 = vrot.slane %v323_v27, 4 }
  0x7f   :  { %v328_v58 = vrot.slane %v326_v29, 5  ;;  %v648_v47 = vor.u32 %v647_v28, %v644_v16  ;;  %v365_v44 = vshrl.u32 %v2726_v2, 16  ;;  %v368_v20 = vshll.u32 %v2726_v2, 16  ;;  %v551_v2 = vld [vmem:[%s3646_s0 + $0x84] sm:$0x3] }
  0x80   :  { %v2899_v55 = vpop.permute.xlu0 %1030  ;;  %1130 = vrot.lane.b32.xlu1 %v2487_v48, %s2104_s16  ;;  %v638_v48 = vrot.slane %v636_v24, 6  ;;  %v346_v18 = vshll.u32 %v2945_v60, 16  ;;  %v343_v8 = vor.u32 %v342_v62, %v339_v11  ;;  %v332_v59 = vshll.u32 %v2950_v7, 16  ;;  %v540_v62 = vld [vmem:[%s3646_s0 + $0x2c] sm:$0x3] }
  0x81   :  { %v351_v27 = vshrl.u32 %v2733_v45, 16  ;;  %v795_v29 = vshrl.u32 %v2620_v35, 16  ;;  %v651_v28 = vshrl.u32 %v2625_v51, 16  ;;  %v370_v11 = vrot.slane %v368_v20, 5 }
  0x82   :  { %1122 = vrot.lane.b32.xlu0 %v2495_v61, %s2104_s16  ;;  %v2913_v34 = vpop.permute.xlu1 %1040  ;;  %v1971_v61 = vcombine.low %v2749_v9, %v757_v5  ;;  %v639_v24 = vor.u32 %v638_v48, %v635_v49  ;;  %v2937_v9 = vsel %vm2302_vm2, %v302_v17, %v306_v31  ;;  %v784_v5 = vrot.slane %v783_v32, 4 }
  0x83   :  { %v2957_v49 = vcombine.low %v2822_v54, %v2937_v9  ;;  %v329_v54 = vor.u32 %v328_v58, %v325_v30  ;;  %v344_v58 = vrot.slane %v343_v8, 4  ;;  %v653_v60 = vrot.slane %v651_v28, 5  ;;  %v3010_v8 = vld [vmem:[%s3646_s0 + $0xac] sm:$0x1] }
  0x84   :  { %v2917_v6 = vpop.permute.xlu0 %1032  ;;  %1314 = vrot.lane.b32.xlu1 %v2904_v4, %s2111_s30  ;;  %v640_v48 = vrot.slane %v639_v24, 4  ;;  %v2968_v32 = vsel %vm2715_vm8, %v784_v5, %v792_v56  ;;  %v654_v5 = vshll.u32 %v2625_v51, 16  ;;  %v367_v56 = vrot.slane %v365_v44, 4 }
  0x85   :  { %v804_v51 = vshrl.u32 %v551_v2, 16  ;;  %v660_v63 = vshrl.u32 %v540_v62, 16 }
  0x86   :  { %1306 = vrot.lane.b32.xlu0 %v2909_v52, %s2111_s30  ;;  %v2928_v1 = vpop.permute.xlu1 %1060  ;;  %v2984_v16 = vsel %vm2715_vm8, %v640_v48, %v648_v47  ;;  %v330_v48 = vrot.slane %v329_v54, 4  ;;  %v334_v47 = vrot.slane %v332_v59, 5  ;;  %v656_v50 = vrot.slane %v654_v5, 6 }
  0x87   :  { %v3001_v44 = vcombine.low %v2892_v19, %v2984_v16  ;;  %v353_v54 = vrot.slane %v351_v27, 4  ;;  %v371_v28 = vor.u32 %v370_v11, %v367_v56  ;;  %v374_v5 = vshll.u32 %v3010_v8, 16 }
  0x88   :  { %v2939_v41 = vpop.permute.xlu0 %1052  ;;  %1338 = vrot.lane.b32.xlu1 %v1971_v61, %s2112_s10  ;;  %v798_v61 = vshll.u32 %v2620_v35, 16  ;;  %v2990_v35 = vcombine.low %v2881_v22, %v2968_v32  ;;  %v797_v22 = vrot.slane %v795_v29, 5  ;;  %v3022_v59 = vsel %vm2302_vm2, %v330_v48, %v334_v47 }
  0x89   :  { %v657_v37 = vor.u32 %v656_v50, %v653_v60  ;;  %v662_v3 = vrot.slane %v660_v63, 5  ;;  %v1935_v56 = vcombine.low %v2937_v9, %v3022_v59  ;;  %v2072_v50 = vld [vmem:[%s3647_s1] sm:$0xff]   ;;  %v372_v11 = vrot.slane %v371_v28, 4 }
  0x8a   :  { %1330 = vrot.lane.b32.xlu0 %v1967_v10, %s2112_s10  ;;  %v2953_v31 = vpop.permute.xlu1 %1062  ;;  %v354_v10 = vshll.u32 %v2733_v45, 16  ;;  %v348_v45 = vrot.slane %v346_v18, 5  ;;  %v800_v20 = vrot.slane %v798_v61, 6  ;;  %v807_v18 = vshll.u32 %v551_v2, 16  ;;  %2003 = vmatprep.subr.bf16.mxu0 %v2072_v50 }
  0x8b   :  { %v806_v2 = vrot.slane %v804_v51, 5  ;;  %v376_v47 = vrot.slane %v374_v5, 5  ;;  %v552_v51 = vld [vmem:[%s3646_s0 + $0x8c] sm:$0x3]  ;;  %2027 = vmatprep.subr.bf16.mxu1 %v2072_v50  ;;  %2004 = vmatpush3.bf16.msra.mxu0 %v2072_v50 }
  0x8c   :  { %v2962_v17 = vpop.permute.xlu0 %1054  ;;  %1132 = vrot.lane.b32.xlu1 %v2933_v25, %s2104_s16  ;;  %v801_v29 = vor.u32 %v800_v20, %v797_v22  ;;  %v809_v61 = vrot.slane %v807_v18, 6  ;;  %v356_v27 = vrot.slane %v354_v10, 5  ;;  %v813_v18 = vshrl.u32 %v2693_v33, 16  ;;  %2031 = vmatpush3.bf16.msra.mxu1 %v2072_v50 }
  0x8e   :  { %1124 = vrot.lane.b32.xlu0 %v2957_v49, %s2104_s16  ;;  %v2980_v24 = vpop.permute.xlu1 %1100  ;;  %v802_v63 = vrot.slane %v801_v29, 4  ;;  %v810_v60 = vor.u32 %v809_v61, %v806_v2  ;;  %v357_v9 = vor.u32 %v356_v27, %v353_v54  ;;  %v669_v29 = vshrl.u32 %v2698_v42, 16 }
  0x8f   :  { %v672_v61 = vshll.u32 %v2698_v42, 16  ;;  %v541_v42 = vld [vmem:[%s3646_s0 + $0x34] sm:$0x3] }
  0x90   :  { %v2995_v30 = vpop.permute.xlu0 %1092  ;;  %1150 = vrot.lane.b32.xlu1 %v2834_v26, %s2105_s22  ;;  %v663_v26 = vshll.u32 %v540_v62, 16  ;;  %v3063_v54 = vsel %vm2715_vm8, %v802_v63, %v810_v60  ;;  %v3074_v27 = vrot.slane %v357_v9, 4  ;;  %v1392_v9 = vsel %vm1386_vm9, %v2227_v40, %v2826_v0 }
  0x91   :  { %v3089_v63 = vcombine.low %v2968_v32, %v3063_v54 }
  0x92   :  { %1142 = vrot.lane.b32.xlu0 %v2838_v13, %s2105_s22  ;;  %v3005_v7 = vpop.permute.xlu1 %1102  ;;  %v3018_v13 = vsel %vm2302_vm2, %v344_v58, %v348_v45  ;;  %v665_v45 = vrot.slane %v663_v26, 6  ;;  %v3032_v58 = vld [vmem:[%s3646_s0 + $0x54] sm:$0x1]  ;;  %v816_v26 = vshll.u32 %v2693_v33, 16  ;;  %v377_v33 = vsel %vm2302_vm2, %v372_v11, %v376_v47 }
  0x93   :  { %v1936_v10 = vcombine.low %v2924_v46, %v3018_v13  ;;  %v658_v46 = vrot.slane %v657_v37, 4  ;;  %v360_v20 = vshll.u32 %v3032_v58, 16  ;;  %v825_v37 = vshll.u32 %v552_v51, 16 }
  0x94   :  { %v3012_v19 = vpop.permute.xlu0 %1094  ;;  %1340 = vrot.lane.b32.xlu1 %v2990_v35, %s2112_s10  ;;  %v666_v22 = vor.u32 %v665_v45, %v662_v3  ;;  %v2073_v3 = vld [vmem:[%s3647_s1 + $0x8] sm:$0xff]   ;;  %v3080_v50 = vrot.slane %v816_v26, 6  ;;  %v3092_v60 = vcombine.low %v3018_v13, %v377_v33  ;;  %v671_v13 = vrot.slane %v669_v29, 5 }
  0x95   :  { %v3076_v45 = vrot.slane %v360_v20, 5  ;;  %2005 = vmatprep.subr.bf16.mxu0 %v2073_v3  ;;  %2028 = vmatprep.subr.bf16.mxu1 %v2073_v3  ;;  %v3096_v47 = vrot.slane %v825_v37, 6 }
  0x96   :  { %1332 = vrot.lane.b32.xlu0 %v3001_v44, %s2112_s10  ;;  %v3027_v62 = vpop.permute.xlu1 %1126  ;;  %v3072_v5 = vsel %vm2715_vm8, %v658_v46, %v666_v22  ;;  %2006 = vmatpush3.bf16.msra.mxu0 %v2073_v3  ;;  %v674_v22 = vrot.slane %v672_v61, 6 }
  0x97   :  { %2032 = vmatpush3.bf16.msra.mxu1 %v2073_v3  ;;  %v3108_v32 = vcombine.low %v2984_v16, %v3072_v5  ;;  %v3698_v16 = vld [vmem:[#allocation5_spill] sm:$0xff]  ;;  %v3700_v3 = vld [vmem:[#allocation6_spill] sm:$0xff] }
  0x98   :  { %v3034_v48 = vpop.permute.xlu0 %1118  ;;  %1358 = vrot.lane.b32.xlu1 %v2904_v4, %s2113_s12  ;;  %v675_v29 = vor.u32 %v674_v22, %v671_v13 }
  0x9a   :  { %1350 = vrot.lane.b32.xlu0 %v2909_v52, %s2113_s12  ;;  %v3050_v4 = vpop.permute.xlu1 %1128  ;;  %v822_v52 = vshrl.u32 %v552_v51, 16  ;;  %v2074_v51 = vld [vmem:[%s3647_s1 + $0x10] sm:$0xff]  }
  0x9b   :  { %2007 = vmatprep.subr.bf16.mxu0 %v2074_v51  ;;  %2029 = vmatprep.subr.bf16.mxu1 %v2074_v51 }
  0x9c   :  { %v3055_v2 = vpop.permute.xlu0 %1120  ;;  %1152 = vrot.lane.b32.xlu1 %v1936_v10, %s2105_s22  ;;  %v3078_v10 = vrot.slane %v813_v18, 5  ;;  %v3094_v11 = vrot.slane %v822_v52, 5  ;;  %2008 = vmatpush3.bf16.msra.mxu0 %v2074_v51 }
  0x9d   :  { %2033 = vmatpush3.bf16.msra.mxu1 %v2074_v51 }
  0x9e   :  { %1144 = vrot.lane.b32.xlu0 %v1935_v56, %s2105_s22  ;;  %v1147_v28 = vpop.permute.xlu1 %1146 }
  0xa0   :  { %v1139_v56 = vpop.permute.xlu0 %1138  ;;  %1170 = vrot.lane.b32.xlu1 %v2933_v25, %s2106_s5  ;;  %v3696_v25 = vcombine.low %v2234_v43, %v2179_v21  ;;  %v363_v21 = vsel %vm2302_vm2, %v3074_v27, %v3076_v45  ;;  %v678_v43 = vshrl.u32 %v541_v42, 16  ;;  %vm1547_vm2 = vcmask 326656  }
  0xa2   :  { %v1401_v46 = vsel %vm1386_vm9, %v3696_v25, %v2869_v38  ;;  %1162 = vrot.lane.b32.xlu0 %v2957_v49, %s2106_s5  ;;  %v1149_v18 = vpop.permute.xlu1 %1148  ;;  %v3697_v38 = vld [vmem:[#allocation9_spill] sm:$0xff]  ;;  %v681_v49 = vshll.u32 %v541_v42, 16 }
  0xa3   :  { %v1421_v20 = vsel %vm1411_vm10, %v1401_v46, %v2888_v39  ;;  %v3699_v26 = vcombine.low %v3697_v38, %v3698_v16  ;;  %v819_v39 = vor.u32 %v3080_v50, %v3078_v10  ;;  %v676_v46 = vrot.slane %v675_v29, 4 }
  0xa4   :  { %v1438_v0 = vsel %vm1428_vm11, %v1421_v20, %v2928_v1  ;;  %v1141_v37 = vpop.permute.xlu0 %1140  ;;  %1360 = vrot.lane.b32.xlu1 %v3089_v63, %s2113_s12  ;;  %v2075_v1 = vld [vmem:[%s3647_s1 + $0x18] sm:$0xff]   ;;  %s2114_s1 = smov 60   ;;  %v497_v20 = vrot.slane %v2754_v23, 5  ;;  %v465_v38 = vrot.slane %v2759_v15, 5 }
  0xa5   :  { %v1389_v40 = vsel %vm1386_vm9, %v3699_v26, %v2840_v57  ;;  %v1455_v52 = vsel %vm1445_vm12, %v1438_v0, %v2980_v24  ;;  %v828_v57 = vor.u32 %v3096_v47, %v3094_v11  ;;  %2009 = vmatprep.subr.bf16.mxu0 %v2075_v1  ;;  %2030 = vmatprep.subr.bf16.mxu1 %v2075_v1 }
  0xa6   :  { %v1413_v14 = vsel %vm1411_vm10, %v1389_v40, %v2899_v55  ;;  %v1404_v55 = vsel %vm1386_vm9, %v3700_v3, %v2856_v53  ;;  %v1472_v33 = vsel %vm1462_vm13, %v1455_v52, %v3027_v62  ;;  %1352 = vrot.lane.b32.xlu0 %v3108_v32, %s2113_s12  ;;  %v1167_v10 = vpop.permute.xlu1 %1166  ;;  %v680_v53 = vrot.slane %v678_v43, 5  ;;  %2010 = vmatpush3.bf16.msra.mxu0 %v2075_v1  ;;  %v3703_v52 = vld [vmem:[#allocation14_spill] sm:$0xff] }
  0xa7   :  { %v1430_v24 = vsel %vm1428_vm11, %v1413_v14, %v2939_v41  ;;  %v1423_v61 = vsel %vm1411_vm10, %v1404_v55, %v2913_v34  ;;  %v1489_v45 = vsel %vm1479_vm14, %v1472_v33, %v1147_v28  ;;  %v683_v34 = vrot.slane %v681_v49, 6  ;;  %2034 = vmatpush3.bf16.msra.mxu1 %v2075_v1  ;;  %v3704_v1 = vld [vmem:[#allocation18_spill] sm:$0xff] }
  0xa8   :  { %v1447_v27 = vsel %vm1445_vm12, %v1430_v24, %v2995_v30  ;;  %v1440_v41 = vsel %vm1428_vm11, %v1423_v61, %v2953_v31  ;;  %v1506_v50 = vsel %vm1496_vm15, %v1489_v45, %v1167_v10  ;;  %v1415_v30 = vsel %vm1411_vm10, %v1392_v9, %v2917_v6  ;;  %v1159_v11 = vpop.permute.xlu0 %1158  ;;  %1378 = vrot.lane.b32.xlu1 %v2990_v35, %s2114_s1  ;;  %v3705_v24 = vld [vmem:[#allocation15_spill] sm:$0xff] }
  0xa9   :  { %v1464_v62 = vsel %vm1462_vm13, %v1447_v27, %v3034_v48  ;;  %v1457_v28 = vsel %vm1445_vm12, %v1440_v41, %v3005_v7  ;;  %v1432_v31 = vsel %vm1428_vm11, %v1415_v30, %v2962_v17  ;;  %v820_v6 = vrot.slane %v819_v39, 4  ;;  %v3181_v17 = vld [vmem:[%s3646_s0 + $0x90] sm:$0xe]  ;;  %v3702_v39 = vld [vmem:[#allocation13_spill] sm:$0xff] }
  0xaa   :  { %v1481_v42 = vsel %vm1479_vm14, %v1464_v62, %v1139_v56  ;;  %v1474_v48 = vsel %vm1462_vm13, %v1457_v28, %v3050_v4  ;;  %v1449_v7 = vsel %vm1445_vm12, %v1432_v31, %v3012_v19  ;;  %1370 = vrot.lane.b32.xlu0 %v3001_v44, %s2114_s1  ;;  %v1169_v51 = vpop.permute.xlu1 %1168  ;;  %v1937_v35 = vcombine.low %v3022_v59, %v363_v21  ;;  %v3192_v44 = vld [vmem:[%s3646_s0 + $0x38] sm:$0xe]  ;;  %v3706_v27 = vld [vmem:[#allocation19_spill] sm:$0xff] }
  0xab   :  { %v1498_v47 = vsel %vm1496_vm15, %v1481_v42, %v1159_v11  ;;  %v1491_v56 = vsel %vm1479_vm14, %v1474_v48, %v1149_v18  ;;  %v1466_v4 = vsel %vm1462_vm13, %v1449_v7, %v3055_v2  ;;  %v684_v19 = vor.u32 %v683_v34, %v680_v53  ;;  %v553_v34 = vld [vmem:[%s3646_s0 + $0x94] sm:$0x3]  ;;  %v3707_v48 = vld [vmem:[#allocation16_spill] sm:$0xff] }
  0xac   :  { %v1508_v25 = vsel %vm1496_vm15, %v1491_v56, %v1169_v51  ;;  %v1483_v13 = vsel %vm1479_vm14, %v1466_v4, %v1141_v37  ;;  %v1161_v22 = vpop.permute.xlu0 %1160  ;;  %1172 = vrot.lane.b32.xlu1 %v3092_v60, %s2106_s5  ;;  %v3197_v2 = vsel %vm2715_vm8, %v820_v6, %v828_v57  ;;  %v1892_v9 = vrot.slane %v3181_v17, 9  ;;  %v3237_v57 = vld [vmem:[%s3646_s0 + $0x40] sm:$0xe]  ;;  %v3283_v6 = vld [vmem:[%s3646_s0 + $0x48] sm:$0xe]  ;;  %v3708_v51 = vld [vmem:[#allocation20_spill] sm:$0xff] }
  0xad   :  { %v1500_v59 = vsel %vm1496_vm15, %v1483_v13, %v1161_v22  ;;  %v3205_v21 = vsel %vm2715_vm8, %v676_v46, %v684_v19  ;;  %v1884_v43 = vrot.slane %v3192_v44, 9  ;;  %v3213_v23 = vcombine.low %v3063_v54, %v3197_v2 }
  0xae   :  { %1164 = vrot.lane.b32.xlu0 %v1937_v35, %s2106_s5  ;;  %v1207_v18 = vpop.permute.xlu1 %1206  ;;  %v498_v0 = vsel %vm2473_vm5, %v1892_v9, %v497_v20  ;;  %v3222_v15 = vcombine.low %v3072_v5, %v3205_v21  ;;  %v509_v3 = vrot.slane %v3704_v1, 5  ;;  %v1893_v61 = vrot.slane %v3237_v57, 9  ;;  %v3710_v9 = vld [vmem:[#allocation21_spill] sm:$0xff] }
  0xaf   :  { %v1523_v60 = vsel %vm1513_vm0, %v1506_v50, %v1207_v18  ;;  %v466_v54 = vsel %vm2473_vm5, %v1884_v43, %v465_v38  ;;  %v1946_v37 = vcombine.low %v3703_v52, %v498_v0  ;;  %v505_v45 = vrot.slane %v3706_v27, 5  ;;  %v3261_v50 = vld [vmem:[%s3646_s0 + $0xa0] sm:$0xe]  ;;  %v3711_v38 = vld [vmem:[#allocation7_spill] sm:$0xff]  ;;  %v3319_v52 = vld [vmem:[%s3646_s0 + $0xa8] sm:$0xe] }
  0xb0   :  { %v1199_v16 = vpop.permute.xlu0 %1198  ;;  %1210 = vrot.lane.b32.xlu1 %v2684_v36, %s2107_s17  ;;  %v3227_v36 = vld [vmem:[%s3646_s0 + $0x98] sm:$0xe]  ;;  %v1942_v33 = vcombine.low %v3705_v24, %v466_v54  ;;  %v831_v30 = vshrl.u32 %v3181_v17, 16  ;;  %v834_v28 = vshll.u32 %v3181_v17, 16  ;;  %v1896_v56 = vrot.slane %v3261_v50, 9 }
  0xb1   :  { %v1515_v26 = vsel %vm1513_vm0, %v1498_v47, %v1199_v16  ;;  %v1894_v5 = vrot.slane %v3227_v36, 9  ;;  %v3273_v11 = vsel %vm2473_vm5, %v1893_v61, %v505_v45  ;;  %v521_v35 = vrot.slane %v3708_v51, 5 }
  0xb2   :  { %1202 = vrot.lane.b32.xlu0 %v3702_v39, %s2107_s17  ;;  %v1021_v49 = vpop.permute.xlu1 %1020  ;;  %v840_v17 = vshrl.u32 %v553_v34, 16  ;;  %v843_v4 = vshll.u32 %v553_v34, 16  ;;  %v3295_v19 = vcombine.low %v466_v54, %v3273_v11  ;;  %v833_v13 = vrot.slane %v831_v30, 5 }
  0xb3   :  { %v3255_v41 = vsel %vm2473_vm5, %v1894_v5, %v509_v3  ;;  %v836_v22 = vrot.slane %v834_v28, 6  ;;  %v517_v20 = vrot.slane %v3710_v9, 5  ;;  %v3308_v43 = vsel %vm2473_vm5, %v1896_v56, %v521_v35 }
  0xb4   :  { %v1013_v14 = vpop.permute.xlu0 %1012  ;;  %1380 = vrot.lane.b32.xlu1 %v3213_v23, %s2114_s1  ;;  %v3278_v47 = vcombine.low %v498_v0, %v3255_v41  ;;  %v1407_v16 = vsel %vm1386_vm9, %v3711_v38, %v1021_v49  ;;  %v687_v0 = vshrl.u32 %v3192_v44, 16  ;;  %v690_v39 = vshll.u32 %v3192_v44, 16 }
  0xb5   :  { %v837_v5 = vor.u32 %v836_v22, %v833_v13  ;;  %v845_v1 = vrot.slane %v843_v4, 6  ;;  %v1956_v27 = vcombine.low %v3255_v41, %v3308_v43  ;;  %v529_v30 = vrot.slane %v3032_v58, 5 }
  0xb6   :  { %1372 = vrot.lane.b32.xlu0 %v3222_v15, %s2114_s1  ;;  %v1209_v55 = vpop.permute.xlu1 %1208  ;;  %v689_v28 = vrot.slane %v687_v0, 5  ;;  %v867_v58 = vshrl.u32 %v3227_v36, 16  ;;  %v849_v13 = vshrl.u32 %v3237_v57, 16  ;;  %v852_v9 = vshll.u32 %v3237_v57, 16  ;;  %v543_v57 = vld [vmem:[%s3646_s0 + $0x44] sm:$0x3] }
  0xb7   :  { %v3245_v29 = vsel %vm1513_vm0, %v1508_v25, %v1209_v55  ;;  %v3709_v25 = vld [vmem:[#allocation17_spill] sm:$0xff]  ;;  %v3712_v55 = vld [vmem:[#allocation8_spill] sm:$0xff] }
  0xb8   :  { %v1201_v10 = vpop.permute.xlu0 %1200  ;;  %1212 = vrot.lane.b32.xlu1 %v1946_v37, %s2107_s17  ;;  %v1395_v44 = vsel %vm1386_vm9, %v3712_v55, %v1013_v14  ;;  %v1898_v14 = vrot.slane %v3319_v52, 9  ;;  %v869_v38 = vrot.slane %v867_v58, 5  ;;  %v851_v55 = vrot.slane %v849_v13, 5 }
  0xb9   :  { %v3251_v53 = vsel %vm1513_vm0, %v1500_v59, %v1201_v10  ;;  %v1895_v59 = vrot.slane %v3283_v6, 9  ;;  %v3336_v10 = vld [vmem:[%s3646_s0 + $0x50] sm:$0xe] }
  0xba   :  { %1204 = vrot.lane.b32.xlu0 %v1942_v33, %s2107_s17  ;;  %v1233_v62 = vpop.permute.xlu1 %1232  ;;  %v1897_v51 = vrot.slane %v3336_v10, 9 }
  0xbb   :  { %v3269_v42 = vsel %vm1530_vm1, %v1523_v60, %v1233_v62  ;;  %v542_v60 = vld [vmem:[%s3646_s0 + $0x3c] sm:$0x3]  ;;  %v3323_v3 = vsel %vm2473_vm5, %v1895_v59, %v517_v20  ;;  %v533_v62 = vrot.slane %v3010_v8, 5 }
  0xbc   :  { %v1225_v31 = vpop.permute.xlu0 %1224  ;;  %1236 = vrot.lane.b32.xlu1 %v3707_v48, %s2108_s4  ;;  %v696_v24 = vshrl.u32 %v542_v60, 16  ;;  %v699_v61 = vshll.u32 %v542_v60, 16  ;;  %v1955_v41 = vcombine.low %v3273_v11, %v3323_v3  ;;  %v838_v48 = vrot.slane %v837_v5, 4  ;;  %v554_v59 = vld [vmem:[%s3646_s0 + $0x9c] sm:$0x3]  ;;  %v3713_v5 = vld [vmem:[#allocation11_spill] sm:$0xff] }
  0xbd   :  { %v3286_v7 = vsel %vm1530_vm1, %v1515_v26, %v1225_v31  ;;  %v842_v26 = vrot.slane %v840_v17, 5  ;;  %v692_v31 = vrot.slane %v690_v39, 6  ;;  %v870_v11 = vshll.u32 %v3227_v36, 16 }
  0xbe   :  { %1228 = vrot.lane.b32.xlu0 %v3709_v25, %s2108_s4  ;;  %v3292_v46 = vpop.permute.xlu1 %1022  ;;  %v698_v35 = vrot.slane %v696_v24, 5  ;;  %v701_v17 = vrot.slane %v699_v61, 6  ;;  %v876_v0 = vshrl.u32 %v554_v59, 16  ;;  %v879_v39 = vshll.u32 %v554_v59, 16 }
  0xbf   :  { %v846_v56 = vor.u32 %v845_v1, %v842_v26  ;;  %v693_v25 = vor.u32 %v692_v31, %v689_v28  ;;  %v1410_v1 = vsel %vm1386_vm9, %v3713_v5, %v3292_v46  ;;  %v861_v61 = vshll.u32 %v543_v57, 16  ;;  %v555_v31 = vld [vmem:[%s3646_s0 + $0xa4] sm:$0x3] }
  0xc0   :  { %v3299_v18 = vpop.permute.xlu0 %1014  ;;  %1238 = vrot.lane.b32.xlu1 %v3278_v47, %s2108_s4  ;;  %v702_v60 = vor.u32 %v701_v17, %v698_v35  ;;  %v903_v46 = vshrl.u32 %v3261_v50, 16  ;;  %v881_v28 = vrot.slane %v879_v39, 6  ;;  %v939_v39 = vshrl.u32 %v3319_v52, 16 }
  0xc1   :  { %v3375_v20 = vsel %vm2715_vm8, %v838_v48, %v846_v56  ;;  %v888_v48 = vshll.u32 %v3283_v6, 16  ;;  %v863_v17 = vrot.slane %v861_v61, 6 }
  0xc2   :  { %1230 = vrot.lane.b32.xlu0 %v3295_v19, %s2108_s4  ;;  %v1043_v54 = vpop.permute.xlu1 %1042 }
  0xc3   :  { %v3326_v49 = vsel %vm1411_vm10, %v1407_v16, %v1043_v54  ;;  %v694_v54 = vrot.slane %v693_v25, 4  ;;  %v915_v25 = vshll.u32 %v555_v31, 16 }
  0xc4   :  { %v1035_v45 = vpop.permute.xlu0 %1034  ;;  %1256 = vrot.lane.b32.xlu1 %v1946_v37, %s2109_s26 }
  0xc5   :  { %v3340_v34 = vsel %vm1411_vm10, %v1395_v44, %v1035_v45  ;;  %v854_v44 = vrot.slane %v852_v9, 6 }
  0xc6   :  { %1248 = vrot.lane.b32.xlu0 %v1942_v33, %s2109_s26  ;;  %v1235_v37 = vpop.permute.xlu1 %1234 }
  0xc7   :  { %v3349_v8 = vsel %vm1530_vm1, %v3245_v29, %v1235_v37  ;;  %v534_v29 = vsel %vm2473_vm5, %v1898_v14, %v533_v62  ;;  %v885_v37 = vshrl.u32 %v3283_v6, 16 }
  0xc8   :  { %v1227_v4 = vpop.permute.xlu0 %1226  ;;  %1258 = vrot.lane.b32.xlu1 %v1956_v27, %s2109_s26  ;;  %v1958_v26 = vcombine.low %v3308_v43, %v534_v29  ;;  %v3714_v27 = vld [vmem:[#allocation12_spill] sm:$0xff]  ;;  %v912_v29 = vshrl.u32 %v555_v31, 16 }
  0xc9   :  { %v3357_v33 = vsel %vm1530_vm1, %v3251_v53, %v1227_v4  ;;  %v530_v53 = vsel %vm2473_vm5, %v1897_v51, %v529_v30  ;;  %v1398_v45 = vsel %vm1386_vm9, %v3714_v27, %v3299_v18  ;;  %v878_v30 = vrot.slane %v876_v0, 5 }
  0xca   :  { %1250 = vrot.lane.b32.xlu0 %v1955_v41, %s2109_s26  ;;  %v1253_v22 = vpop.permute.xlu1 %1252  ;;  %v1957_v43 = vcombine.low %v3323_v3, %v530_v53  ;;  %v3410_v18 = vcombine.low %v3197_v2, %v3375_v20  ;;  %v703_v41 = vsel %vm2715_vm8, %v694_v54, %v702_v60  ;;  %v855_v51 = vor.u32 %v854_v44, %v851_v55  ;;  %v544_v2 = vld [vmem:[%s3646_s0 + $0x4c] sm:$0x3] }
  0xcb   :  { %v3369_v36 = vsel %vm1547_vm2, %v3269_v42, %v1253_v22  ;;  %v872_v42 = vrot.slane %v870_v11, 6  ;;  %v905_v4 = vrot.slane %v903_v46, 5  ;;  %v3427_v6 = vcombine.low %v3205_v21, %v703_v41 }
  0xcc   :  { %v1245_v16 = vpop.permute.xlu0 %1244  ;;  %1276 = vrot.lane.b32.xlu1 %v3278_v47, %s2110_s24  ;;  %v882_v22 = vor.u32 %v881_v28, %v878_v30  ;;  %v887_v9 = vrot.slane %v885_v37, 5  ;;  %v890_v53 = vrot.slane %v888_v48, 6  ;;  %v897_v60 = vshll.u32 %v544_v2, 16 }
  0xcd   :  { %v3385_v40 = vsel %vm1547_vm2, %v3286_v7, %v1245_v16  ;;  %v858_v7 = vshrl.u32 %v543_v57, 16  ;;  %v873_v3 = vor.u32 %v872_v42, %v869_v38  ;;  %v856_v21 = vrot.slane %v855_v51, 4 }
  0xce   :  { %1268 = vrot.lane.b32.xlu0 %v3295_v19, %s2110_s24  ;;  %v1045_v47 = vpop.permute.xlu1 %1044  ;;  %v906_v19 = vshll.u32 %v3261_v50, 16  ;;  %v914_v57 = vrot.slane %v912_v29, 5  ;;  %v917_v42 = vrot.slane %v915_v25, 6  ;;  %v891_v5 = vor.u32 %v890_v53, %v887_v9 }
  0xcf   :  { %v3394_v24 = vsel %vm1411_vm10, %v1410_v1, %v1045_v47  ;;  %v860_v35 = vrot.slane %v858_v7, 5  ;;  %v874_v13 = vrot.slane %v873_v3, 4  ;;  %v899_v55 = vrot.slane %v897_v60, 6 }
  0xd0   :  { %v1037_v62 = vpop.permute.xlu0 %1036  ;;  %1278 = vrot.lane.b32.xlu1 %v1958_v26, %s2110_s24  ;;  %v908_v11 = vrot.slane %v906_v19, 6  ;;  %v924_v44 = vshll.u32 %v3336_v10, 16  ;;  %v892_v31 = vrot.slane %v891_v5, 4  ;;  %vm1598_vm5 = vcmask 424960  }
  0xd1   :  { %v3403_v14 = vsel %vm1411_vm10, %v1398_v45, %v1037_v62  ;;  %v864_v16 = vor.u32 %v863_v17, %v860_v35  ;;  %v883_v0 = vsel %vm2715_vm8, %v874_v13, %v882_v22  ;;  %v918_v45 = vor.u32 %v917_v42, %v914_v57 }
  0xd2   :  { %1270 = vrot.lane.b32.xlu0 %v1957_v43, %s2110_s24  ;;  %v1065_v50 = vpop.permute.xlu1 %1064  ;;  %v545_v43 = vld [vmem:[%s3646_s0 + $0x54] sm:$0x3]  ;;  %v1974_v61 = vcombine.low %v3375_v20, %v883_v0  ;;  %v941_v62 = vrot.slane %v939_v39, 5  ;;  %v926_v48 = vrot.slane %v924_v44, 6  ;;  %vm1843_vm9 = vcmask 60416  }
  0xd3   :  { %v3419_v56 = vsel %vm1428_vm11, %v3326_v49, %v1065_v50  ;;  %v865_v47 = vsel %vm2715_vm8, %v856_v21, %v864_v16  ;;  %v930_v50 = vshrl.u32 %v545_v43, 16  ;;  %v933_v20 = vshll.u32 %v545_v43, 16 }
  0xd4   :  { %v1057_v58 = vpop.permute.xlu0 %1056  ;;  %1316 = vrot.lane.b32.xlu1 %v3089_v63, %s2111_s30  ;;  %v894_v63 = vshrl.u32 %v544_v2, 16  ;;  %v1970_v28 = vcombine.low %v703_v41, %v865_v47 }
  0xd5   :  { %v3431_v49 = vsel %vm1428_vm11, %v3340_v34, %v1057_v58  ;;  %v909_v34 = vor.u32 %v908_v11, %v905_v4  ;;  %v932_v29 = vrot.slane %v930_v50, 5  ;;  %v935_v25 = vrot.slane %v933_v20, 6 }
  0xd6   :  { %1308 = vrot.lane.b32.xlu0 %v3108_v32, %s2111_s30  ;;  %v1255_v59 = vpop.permute.xlu1 %1254  ;;  %v896_v1 = vrot.slane %v894_v63, 5 }
  0xd7   :  { %v3437_v38 = vsel %vm1547_vm2, %v3349_v8, %v1255_v59  ;;  %v942_v8 = vshll.u32 %v3319_v52, 16  ;;  %v921_v52 = vshrl.u32 %v3336_v10, 16  ;;  %v910_v27 = vrot.slane %v909_v34, 4 }
  0xd8   :  { %v1247_v26 = vpop.permute.xlu0 %1246  ;;  %1318 = vrot.lane.b32.xlu1 %v3410_v18, %s2111_s30  ;;  %v900_v10 = vor.u32 %v899_v55, %v896_v1  ;;  %v936_v60 = vor.u32 %v935_v25, %v932_v29 }
  0xd9   :  { %v3443_v32 = vsel %vm1547_vm2, %v3357_v33, %v1247_v26  ;;  %v556_v33 = vld [vmem:[%s3646_s0 + $0xac] sm:$0x3]  ;;  %v944_v46 = vrot.slane %v942_v8, 6  ;;  %v919_v35 = vsel %vm2715_vm8, %v910_v27, %v918_v45 }
  0xda   :  { %1310 = vrot.lane.b32.xlu0 %v3427_v6, %s2111_s30  ;;  %v3451_v54 = vpop.permute.xlu1 %1272  ;;  %v948_v19 = vshrl.u32 %v556_v33, 16  ;;  %v951_v3 = vshll.u32 %v556_v33, 16 }
  0xdb   :  { %v945_v17 = vor.u32 %v944_v46, %v941_v62 }
  0xdc   :  { %v3463_v7 = vpop.permute.xlu0 %1264  ;;  %1342 = vrot.lane.b32.xlu1 %v3213_v23, %s2112_s10  ;;  %v923_v23 = vrot.slane %v921_v52, 5  ;;  %v950_v41 = vrot.slane %v948_v19, 5  ;;  %v953_v2 = vrot.slane %v951_v3, 6 }
  0xdd   :  { %v946_v59 = vrot.slane %v945_v17, 4  ;;  %v1574_v17 = vsel %vm1564_vm3, %v3369_v36, %v3451_v54 }
  0xde   :  { %1334 = vrot.lane.b32.xlu0 %v3222_v15, %s2112_s10  ;;  %v1067_v30 = vpop.permute.xlu1 %1066  ;;  %v927_v11 = vor.u32 %v926_v48, %v923_v23  ;;  %v954_v9 = vor.u32 %v953_v2, %v950_v41 }
  0xdf   :  { %v1444_v37 = vsel %vm1428_vm11, %v3394_v24, %v1067_v30  ;;  %v901_v24 = vsel %vm2715_vm8, %v892_v31, %v900_v10 }
  0xe0   :  { %v1059_v51 = vpop.permute.xlu0 %1058  ;;  %1344 = vrot.lane.b32.xlu1 %v1974_v61, %s2112_s10  ;;  %v1975_v63 = vcombine.low %v865_v47, %v901_v24 }
  0xe1   :  { %v1436_v15 = vsel %vm1428_vm11, %v3403_v14, %v1059_v51  ;;  %v1976_v14 = vcombine.low %v883_v0, %v919_v35 }
  0xe2   :  { %1336 = vrot.lane.b32.xlu0 %v1970_v28, %s2112_s10  ;;  %v1105_v58 = vpop.permute.xlu1 %1104 }
  0xe3   :  { %v1459_v4 = vsel %vm1445_vm12, %v3419_v56, %v1105_v58  ;;  %v928_v56 = vrot.slane %v927_v11, 4  ;;  %v1566_v58 = vsel %vm1564_vm3, %v3385_v40, %v3463_v7 }
  0xe4   :  { %v1097_v13 = vpop.permute.xlu0 %1096  ;;  %1362 = vrot.lane.b32.xlu1 %v3410_v18, %s2113_s12  ;;  %v955_v18 = vsel %vm2715_vm8, %v946_v59, %v954_v9 }
  0xe5   :  { %v1451_v22 = vsel %vm1445_vm12, %v3431_v49, %v1097_v13  ;;  %v937_v16 = vsel %vm2715_vm8, %v928_v56, %v936_v60  ;;  %vm1681_vm8 = vcmask 523264  }
  0xe6   :  { %1354 = vrot.lane.b32.xlu0 %v3427_v6, %s2113_s12  ;;  %v3488_v53 = vpop.permute.xlu1 %1274  ;;  %v1978_v6 = vcombine.low %v919_v35, %v955_v18  ;;  %v1977_v57 = vcombine.low %v901_v24, %v937_v16 }
  0xe7   :  { %v1576_v59 = vsel %vm1564_vm3, %v3437_v38, %v3488_v53 }
  0xe8   :  { %v3490_v21 = vpop.permute.xlu0 %1266  ;;  %1364 = vrot.lane.b32.xlu1 %v1976_v14, %s2113_s12 }
  0xe9   :  { %v1568_v56 = vsel %vm1564_vm3, %v3443_v32, %v3490_v21 }
  0xea   :  { %1356 = vrot.lane.b32.xlu0 %v1975_v63, %s2113_s12  ;;  %v1313_v49 = vpop.permute.xlu1 %1312 }
  0xeb   :  { %v1591_v41 = vsel %vm1581_vm4, %v1574_v17, %v1313_v49 }
  0xec   :  { %v1305_v26 = vpop.permute.xlu0 %1304  ;;  %1382 = vrot.lane.b32.xlu1 %v1974_v61, %s2114_s1 }
  0xee   :  { %1374 = vrot.lane.b32.xlu0 %v1970_v28, %s2114_s1  ;;  %v1107_v34 = vpop.permute.xlu1 %1106 }
  0xef   :  { %v1461_v42 = vsel %vm1445_vm12, %v1444_v37, %v1107_v34 }
  0xf0   :  { %v1099_v0 = vpop.permute.xlu0 %1098  ;;  %1384 = vrot.lane.b32.xlu1 %v1978_v6, %s2114_s1 }
  0xf1   :  { %v1453_v39 = vsel %vm1445_vm12, %v1436_v15, %v1099_v0 }
  0xf2   :  { %1376 = vrot.lane.b32.xlu0 %v1977_v57, %s2114_s1  ;;  %v1131_v8 = vpop.permute.xlu1 %1130 }
  0xf3   :  { %v1476_v12 = vsel %vm1462_vm13, %v1459_v4, %v1131_v8  ;;  %v1583_v4 = vsel %vm1581_vm4, %v1566_v58, %v1305_v26 }
  0xf4   :  { %v1123_v5 = vpop.permute.xlu0 %1122 }
  0xf5   :  { %v1468_v1 = vsel %vm1462_vm13, %v1451_v22, %v1123_v5 }
  0xf6   :  { %v1315_v55 = vpop.permute.xlu1 %1314 }
  0xf7   :  { %v1593_v9 = vsel %vm1581_vm4, %v1576_v59, %v1315_v55 }
  0xf8   :  { %v1307_v33 = vpop.permute.xlu0 %1306 }
  0xf9   :  { %v1585_v18 = vsel %vm1581_vm4, %v1568_v56, %v1307_v33 }
  0xfa   :  { %v1339_v47 = vpop.permute.xlu1 %1338 }
  0xfb   :  { %v1608_v24 = vsel %vm1598_vm5, %v1591_v41, %v1339_v47 }
  0xfc   :  { %v1331_v43 = vpop.permute.xlu0 %1330 }
  0xfd   :  { %v1600_v25 = vsel %vm1598_vm5, %v1583_v4, %v1331_v43 }
  0xfe   :  { %v1133_v52 = vpop.permute.xlu1 %1132 }
  0xff   :  { %v1478_v44 = vsel %vm1462_vm13, %v1461_v42, %v1133_v52 }
 0x100   :  { %v1125_v61 = vpop.permute.xlu0 %1124 }
 0x101   :  { %v1470_v27 = vsel %vm1462_vm13, %v1453_v39, %v1125_v61 }
 0x102   :  { %v1151_v45 = vpop.permute.xlu1 %1150 }
 0x103   :  { %v1493_v62 = vsel %vm1479_vm14, %v1476_v12, %v1151_v45 }
 0x104   :  { %v1143_v46 = vpop.permute.xlu0 %1142 }
 0x105   :  { %v1485_v19 = vsel %vm1479_vm14, %v1468_v1, %v1143_v46 }
 0x106   :  { %v1341_v3 = vpop.permute.xlu1 %1340 }
 0x107   :  { %v1610_v60 = vsel %vm1598_vm5, %v1593_v9, %v1341_v3 }
 0x108   :  { %v1333_v30 = vpop.permute.xlu0 %1332 }
 0x109   :  { %v1602_v26 = vsel %vm1598_vm5, %v1585_v18, %v1333_v30 }
 0x10a   :  { %v1359_v28 = vpop.permute.xlu1 %1358 }
 0x10b   :  { %v1625_v11 = vsel %vm1615_vm6, %v1608_v24, %v1359_v28 }
 0x10c   :  { %v1351_v31 = vpop.permute.xlu0 %1350 }
 0x10d   :  { %v1617_v54 = vsel %vm1615_vm6, %v1600_v25, %v1351_v31 }
 0x10e   :  { %v1153_v10 = vpop.permute.xlu1 %1152 }
 0x10f   :  { %v3511_v50 = vsel %vm1479_vm14, %v1478_v44, %v1153_v10 }
 0x110   :  { %v1145_v37 = vpop.permute.xlu0 %1144 }
 0x111   :  { %v3514_v23 = vsel %vm1479_vm14, %v1470_v27, %v1145_v37 }
 0x112   :  { %v1171_v48 = vpop.permute.xlu1 %1170 }
 0x113   :  { %v3517_v20 = vsel %vm1496_vm15, %v1493_v62, %v1171_v48 }
 0x114   :  { %v1163_v51 = vpop.permute.xlu0 %1162 }
 0x115   :  { %v3520_v35 = vsel %vm1496_vm15, %v1485_v19, %v1163_v51 }
 0x116   :  { %v1361_v15 = vpop.permute.xlu1 %1360 }
 0x117   :  { %v1627_v49 = vsel %vm1615_vm6, %v1610_v60, %v1361_v15 }
 0x118   :  { %v1353_v2 = vpop.permute.xlu0 %1352 }
 0x119   :  { %v1619_v38 = vsel %vm1615_vm6, %v1602_v26, %v1353_v2 }
 0x11a   :  { %v1379_v29 = vpop.permute.xlu1 %1378 }
 0x11b   :  { %v1642_v36 = vsel %vm1632_vm7, %v1625_v11, %v1379_v29 }
 0x11c   :  { %v1371_v13 = vpop.permute.xlu0 %1370  ;;  %2019 = vmatprep.mubr.msk.bf16.mxu1 %vm1681_vm8, %v1642_v36 }
 0x11d   :  { %v1634_v14 = vsel %vm1632_vm7, %v1617_v54, %v1371_v13 }
 0x11e   :  { %2011 = vmatprep.mubr.msk.bf16.mxu0 %vm1681_vm8, %v1634_v14  ;;  %v1173_v40 = vpop.permute.xlu1 %1172 }
 0x11f   :  { %v1512_v51 = vsel %vm1496_vm15, %v3511_v50, %v1173_v40 }
 0x120   :  { %v1165_v7 = vpop.permute.xlu0 %1164 }
 0x122   :  { %v1211_v22 = vpop.permute.xlu1 %1210 }
 0x123   :  { %v1527_v30 = vsel %vm1513_vm0, %v3517_v20, %v1211_v22 }
 0x124   :  { %v1203_v63 = vpop.permute.xlu0 %1202 }
 0x125   :  { %v1519_v10 = vsel %vm1513_vm0, %v3520_v35, %v1203_v63  ;;  %v1504_v35 = vsel %vm1496_vm15, %v3514_v23, %v1165_v7 }
 0x126   :  { %v1381_v16 = vpop.permute.xlu1 %1380 }
 0x127   :  { %v1644_v6 = vsel %vm1632_vm7, %v1627_v49, %v1381_v16 }
 0x128   :  { %v1373_v53 = vpop.permute.xlu0 %1372  ;;  %2020 = vmatmul.mubr.msk.bf16.vlgmr.msra.gmra.mrb[0].mxu1 %vm1681_vm8, %v1644_v6 }
 0x129   :  { %v1636_v34 = vsel %vm1632_vm7, %v1619_v38, %v1373_v53 }
 0x12a   :  { %2012 = vmatmul.mubr.msk.bf16.vlgmr.msra.gmra.mrb[0].mxu0 %vm1681_vm8, %v1636_v34  ;;  %v1213_v32 = vpop.permute.xlu1 %1212 }
 0x12b   :  { %v1529_v41 = vsel %vm1513_vm0, %v1512_v51, %v1213_v32  ;;  %v3599_v32 = vld [vmem:[%s3648_s2] ss:$0 sm:$0xff]  ;;  %s2115_s2 = smov [#allocation2]  }
 0x12c   :  { %v1205_v21 = vpop.permute.xlu0 %1204  ;;  %s1865_s10 = sshll.u32 %s2115_s2, 4  ;;  %s1866_s10 = int_to_ptr.vmem [resolvable:$true] %s1865_s10 }
 0x12d   :  { %v1521_v11 = vsel %vm1513_vm0, %v1504_v35, %v1205_v21  ;;  %s2076_s12 = scalar_lea.vmem %s1866_s10, 1024  ;;  %p2081_p1 = scmp.lt.s32.totalorder %s1866_s10, %s1866_s10 }
 0x12e   :  { %v1237_v57 = vpop.permute.xlu1 %1236  ;;  %p2077_p0 = scmp.ne.s32.totalorder %s1866_s10, %s2076_s12  ;;  %p2082_p2 = scmp.lt.s32.totalorder %s2076_s12, %s2076_s12 }
 0x12f   :  { %v1544_v31 = vsel %vm1530_vm1, %v1527_v30, %v1237_v57 }
 0x130   :  { %v1229_v42 = vpop.permute.xlu0 %1228  ;;  %p2083_p3 = por %p2082_p2, %p2081_p1 }
 0x131   :  { %v1536_v15 = vsel %vm1530_vm1, %v1519_v10, %v1229_v42 }
 0x132   :  { %v1239_v0 = vpop.permute.xlu1 %1238  ;;  %p2084_p4 = pnand %p2083_p3, %p2077_p0 }
 0x133   :  { %v1546_v24 = vsel %vm1530_vm1, %v1529_v41, %v1239_v0 }
 0x134   :  { %v1231_v39 = vpop.permute.xlu0 %1230 }
 0x135   :  { %v1538_v13 = vsel %vm1530_vm1, %v1521_v11, %v1231_v39 }
 0x136   :  { %v1257_v8 = vpop.permute.xlu1 %1256 }
 0x137   :  { %v1561_v37 = vsel %vm1547_vm2, %v1544_v31, %v1257_v8 }
 0x138   :  { %v1249_v12 = vpop.permute.xlu0 %1248 }
 0x139   :  { %v1553_v20 = vsel %vm1547_vm2, %v1536_v15, %v1249_v12 }
 0x13a   :  { %v1259_v5 = vpop.permute.xlu1 %1258 }
 0x13b   :  { %v1563_v29 = vsel %vm1547_vm2, %v1546_v24, %v1259_v5 }
 0x13c   :  { %v1251_v1 = vpop.permute.xlu0 %1250 }
 0x13d   :  { %v1555_v7 = vsel %vm1547_vm2, %v1538_v13, %v1251_v1 }
 0x13e   :  { %v1277_v55 = vpop.permute.xlu1 %1276 }
 0x13f   :  { %v1578_v17 = vsel %vm1564_vm3, %v1561_v37, %v1277_v55 }
 0x140   :  { %v1269_v33 = vpop.permute.xlu0 %1268 }
 0x141   :  { %v1570_v4 = vsel %vm1564_vm3, %v1553_v20, %v1269_v33 }
 0x142   :  { %v1279_v47 = vpop.permute.xlu1 %1278 }
 0x143   :  { %v1580_v14 = vsel %vm1564_vm3, %v1563_v29, %v1279_v47 }
 0x144   :  { %v1271_v43 = vpop.permute.xlu0 %1270 }
 0x145   :  { %v1572_v63 = vsel %vm1564_vm3, %v1555_v7, %v1271_v43 }
 0x146   :  { %v1317_v52 = vpop.permute.xlu1 %1316 }
 0x147   :  { %v1595_v2 = vsel %vm1581_vm4, %v1578_v17, %v1317_v52 }
 0x148   :  { %v1309_v44 = vpop.permute.xlu0 %1308 }
 0x149   :  { %v1587_v25 = vsel %vm1581_vm4, %v1570_v4, %v1309_v44 }
 0x14a   :  { %v1319_v61 = vpop.permute.xlu1 %1318 }
 0x14b   :  { %v1597_v22 = vsel %vm1581_vm4, %v1580_v14, %v1319_v61 }
 0x14c   :  { %v1311_v27 = vpop.permute.xlu0 %1310 }
 0x14d   :  { %v1589_v18 = vsel %vm1581_vm4, %v1572_v63, %v1311_v27 }
 0x14e   :  { %v1343_v45 = vpop.permute.xlu1 %1342 }
 0x14f   :  { %v1612_v50 = vsel %vm1598_vm5, %v1595_v2, %v1343_v45 }
 0x150   :  { %v1335_v62 = vpop.permute.xlu0 %1334 }
 0x151   :  { %v1604_v23 = vsel %vm1598_vm5, %v1587_v25, %v1335_v62 }
 0x152   :  { %v1345_v46 = vpop.permute.xlu1 %1344 }
 0x153   :  { %v1614_v56 = vsel %vm1598_vm5, %v1597_v22, %v1345_v46 }
 0x154   :  { %v1337_v19 = vpop.permute.xlu0 %1336 }
 0x155   :  { %v1606_v26 = vsel %vm1598_vm5, %v1589_v18, %v1337_v19 }
 0x156   :  { %v1363_v3 = vpop.permute.xlu1 %1362 }
 0x157   :  { %v1629_v36 = vsel %vm1615_vm6, %v1612_v50, %v1363_v3 }
 0x158   :  { %v1355_v28 = vpop.permute.xlu0 %1354 }
 0x159   :  { %v1621_v59 = vsel %vm1615_vm6, %v1604_v23, %v1355_v28 }
 0x15a   :  { %v1365_v48 = vpop.permute.xlu1 %1364 }
 0x15b   :  { %v1631_v49 = vsel %vm1615_vm6, %v1614_v56, %v1365_v48 }
 0x15c   :  { %v1357_v58 = vpop.permute.xlu0 %1356 }
 0x15d   :  { %v1623_v38 = vsel %vm1615_vm6, %v1606_v26, %v1357_v58 }
 0x15e   :  { %v1383_v54 = vpop.permute.xlu1 %1382 }
 0x15f   :  { %v1646_v40 = vsel %vm1632_vm7, %v1629_v36, %v1383_v54 }
 0x160   :  { %v1375_v9 = vpop.permute.xlu0 %1374  ;;  %2023 = vmatprep.mubr.msk.bf16.mxu1 %vm1681_vm8, %v1646_v40 }
 0x161   :  { %v1638_v60 = vsel %vm1632_vm7, %v1621_v59, %v1375_v9 }
 0x162   :  { %2015 = vmatprep.mubr.msk.bf16.mxu0 %vm1681_vm8, %v1638_v60  ;;  %v1385_v16 = vpop.permute.xlu1 %1384 }
 0x163   :  { %v1648_v6 = vsel %vm1632_vm7, %v1631_v49, %v1385_v16 }
 0x164   :  { %v1377_v53 = vpop.permute.xlu0 %1376  ;;  %2024 = vmatmul.mubr.msk.bf16.gmra.mrb[4].mxu1 %vm1681_vm8, %v1648_v6 }
 0x165   :  { %v1640_v34 = vsel %vm1632_vm7, %v1623_v38, %v1377_v53 }
 0x166   :  { %2016 = vmatmul.mubr.msk.bf16.gmra.mrb[4].mxu0 %vm1681_vm8, %v1640_v34 }
 0x1fb   :  { %v2021_v21 = vpop.f32.mrb[0].mxu1 }
 0x1fc   :  { %v1805_v57 = vadd.f32 %v2021_v21, %v3599_v32  ;;  %v1764_v42 = vpop.f32.mrb[1].mxu1 }
 0x1fd   :  { %v2013_v0 = vpop.f32.mrb[0].mxu0  ;;  %v1803_v39 = vadd.f32 %v3599_v32, %v1764_v42  ;;  %v2022_v8 = vpop.f32.mrb[2].mxu1 }
 0x1fe   :  { %v1797_v12 = vadd.f32 %v2013_v0, %v3599_v32  ;;  %v1821_v5 = vmax.f32 %v1805_v57, 0.0  ;;  %v1732_v1 = vpop.f32.mrb[1].mxu0  ;;  %v1806_v55 = vadd.f32 %v2022_v8, %v3599_v32  ;;  %v1767_v33 = vpop.f32.mrb[3].mxu1 }
 0x1ff   :  { %v1795_v47 = vadd.f32 %v3599_v32, %v1732_v1  ;;  %v1819_v43 = vmax.f32 %v1803_v39, 0.0  ;;  %v2014_v52 = vpop.f32.mrb[2].mxu0  ;;  %v1804_v44 = vadd.f32 %v3599_v32, %v1767_v33 }
 0x200   :  { %v1813_v61 = vmax.f32 %v1797_v12, 0.0  ;;  %v1837_v27 = vpack.c.bf16 %v1821_v5, %v1821_v5  ;;  %v1798_v45 = vadd.f32 %v2014_v52, %v3599_v32  ;;  %v1822_v62 = vmax.f32 %v1806_v55, 0.0  ;;  %v1735_v46 = vpop.f32.mrb[3].mxu0 }
 0x201   :  { %v1811_v19 = vmax.f32 %v1795_v47, 0.0  ;;  %v1835_v3 = vpack.c.bf16 %v1819_v43, %v1819_v43  ;;  %v1796_v30 = vadd.f32 %v3599_v32, %v1735_v46  ;;  %v1820_v28 = vmax.f32 %v1804_v44, 0.0 }
 0x202   :  { %v1829_v31 = vpack.c.bf16 %v1813_v61, %v1813_v61  ;;  %1854 = vst.msk [vmem:[#allocation2 + $0x28] sm:$0xf] %vm1843_vm9, %v1837_v27  ;;  %v1814_v10 = vmax.f32 %v1798_v45, 0.0  ;;  %v1838_v37 = vpack.c.bf16 %v1822_v62, %v1822_v62 }
 0x203   :  { %v1827_v48 = vpack.c.bf16 %v1811_v19, %v1811_v19  ;;  %1852 = vst.msk [vmem:[#allocation2 + $0x20] sm:$0xf] %vm1843_vm9, %v1835_v3  ;;  %v1812_v51 = vmax.f32 %v1796_v30, 0.0  ;;  %v1836_v15 = vpack.c.bf16 %v1820_v28, %v1820_v28 }
 0x204   :  { %1846 = vst.msk [vmem:[#allocation2 + $0x8] sm:$0xf] %vm1843_vm9, %v1829_v31  ;;  %v1830_v17 = vpack.c.bf16 %v1814_v10, %v1814_v10  ;;  %1855 = vst.msk [vmem:[#allocation2 + $0x2c] sm:$0xf] %vm1843_vm9, %v1838_v37 }
 0x205   :  { %1844 = vst.msk [vmem:[#allocation2] sm:$0xf] %vm1843_vm9, %v1827_v48  ;;  %v1828_v41 = vpack.c.bf16 %v1812_v51, %v1812_v51  ;;  %1853 = vst.msk [vmem:[#allocation2 + $0x24] sm:$0xf] %vm1843_vm9, %v1836_v15 }
 0x206   :  { %1847 = vst.msk [vmem:[#allocation2 + $0xc] sm:$0xf] %vm1843_vm9, %v1830_v17 }
 0x207   :  { %1845 = vst.msk [vmem:[#allocation2 + $0x4] sm:$0xf] %vm1843_vm9, %v1828_v41 }
 0x237   :  { %v2025_v20 = vpop.f32.mrb[4].mxu1 }
 0x238   :  { %v1809_v2 = vadd.f32 %v2025_v20, %v3599_v32  ;;  %v1780_v58 = vpop.f32.mrb[5].mxu1 }
 0x239   :  { %v2017_v35 = vpop.f32.mrb[4].mxu0  ;;  %v1807_v24 = vadd.f32 %v3599_v32, %v1780_v58  ;;  %v2026_v4 = vpop.f32.mrb[6].mxu1 }
 0x23a   :  { %v1801_v50 = vadd.f32 %v2017_v35, %v3599_v32  ;;  %v1825_v11 = vmax.f32 %v1809_v2, 0.0  ;;  %v1748_v29 = vpop.f32.mrb[5].mxu0  ;;  %v1810_v25 = vadd.f32 %v2026_v4, %v3599_v32  ;;  %v1783_v36 = vpop.f32.mrb[7].mxu1 }
 0x23b   :  { %v1799_v54 = vadd.f32 %v3599_v32, %v1748_v29  ;;  %v1823_v13 = vmax.f32 %v1807_v24, 0.0  ;;  %v2018_v14 = vpop.f32.mrb[6].mxu0  ;;  %v1808_v23 = vadd.f32 %v3599_v32, %v1783_v36 }
 0x23c   :  { %v1817_v40 = vmax.f32 %v1801_v50, 0.0  ;;  %v1841_v7 = vpack.c.bf16 %v1825_v11, %v1825_v11  ;;  %v1802_v22 = vadd.f32 %v2018_v14, %v3599_v32  ;;  %v1826_v59 = vmax.f32 %v1810_v25, 0.0  ;;  %v1751_v9 = vpop.f32.mrb[7].mxu0 }
 0x23d   :  { %v1815_v63 = vmax.f32 %v1799_v54, 0.0  ;;  %v1839_v56 = vpack.c.bf16 %v1823_v13, %v1823_v13  ;;  %v1800_v60 = vadd.f32 %v3599_v32, %v1751_v9  ;;  %v1824_v18 = vmax.f32 %v1808_v23, 0.0 }
 0x23e   :  { %v1833_v49 = vpack.c.bf16 %v1817_v40, %v1817_v40  ;;  %1858 = vst.msk [vmem:[#allocation2 + $0x38] sm:$0xf] %vm1843_vm9, %v1841_v7  ;;  %v1818_v16 = vmax.f32 %v1802_v22, 0.0  ;;  %v1842_v26 = vpack.c.bf16 %v1826_v59, %v1826_v59 }
 0x23f   :  { %v1831_v6 = vpack.c.bf16 %v1815_v63, %v1815_v63  ;;  %1856 = vst.msk [vmem:[#allocation2 + $0x30] sm:$0xf] %vm1843_vm9, %v1839_v56  ;;  %v1816_v38 = vmax.f32 %v1800_v60, 0.0  ;;  %v1840_v53 = vpack.c.bf16 %v1824_v18, %v1824_v18 }
 0x240   :  { %1850 = vst.msk [vmem:[#allocation2 + $0x18] sm:$0xf] %vm1843_vm9, %v1833_v49  ;;  %v1834_v34 = vpack.c.bf16 %v1818_v16, %v1818_v16  ;;  %1859 = vst.msk [vmem:[#allocation2 + $0x3c] sm:$0xf] %vm1843_vm9, %v1842_v26 }
 0x241   :  { %1848 = vst.msk [vmem:[#allocation2 + $0x10] sm:$0xf] %vm1843_vm9, %v1831_v6  ;;  %v1832_v32 = vpack.c.bf16 %v1816_v38, %v1816_v38  ;;  %1857 = vst.msk [vmem:[#allocation2 + $0x34] sm:$0xf] %vm1843_vm9, %v1840_v53 }
 0x242   :  { %1851 = vst.msk [vmem:[#allocation2 + $0x1c] sm:$0xf] %vm1843_vm9, %v1834_v34 }
 0x243   :  { %1849 = vst.msk [vmem:[#allocation2 + $0x14] sm:$0xf] %vm1843_vm9, %v1832_v32 }
 0x244   :  { %2087 = shalt.err (!%p2084_p4)
}
 0x245   :  { %s2088_s19 = scalar_lea.hbm %s3649_s3, 1024 }
 0x246   :  { %p2089_p5 = scmp.ne.s32.totalorder %s3649_s3, %s2088_s19  ;;  %p2092_p6 = scmp.lt.u32.totalorder %s2088_s19, %s3649_s3 }
 0x248   :  { %p2094_p7 = pnand %p2092_p6, %p2089_p5 }
 0x24a   :  { %2097 = shalt.err (!%p2094_p7)
}
 0x24b   :  { %s2116_s27 = smov 64  }
 0x24c   :  { %1871 = dma.vmem_to_hbm [thread:$0]  %s1866_s10, 1024, %s3649_s3, [#allocation3], %s2116_s27, %s2116_s27, %s2100_s20  }
 0x24d   :  { %2098 = dma.done.wait [#allocation3], 1024  }
 0x24e   :  { %2099 = vsyncadd [#allocation3], 4294966272 }
 0x24f   :  { %1875 = vsyncpa [#allocation3], 1 }

</bundles_post_ra>
